<compile_context>
chip_gen: v7x
topology: tpu7x:2x2x1
jax: 0.10.0
libtpu: 0.0.40
codegen_flags: <defaults>
</compile_context>

<pallas_src>
import functools

import jax
import jax.numpy as jnp
from jax.experimental import pallas as pl
from jax.experimental.pallas import tpu as pltpu

LN_EPS = 1e-5            # torch.nn.LayerNorm default eps
_UNROLL_MAX_HIDDEN = 4   # static-unroll hidden layers up to this count

_VMEM_SPEC = pl.BlockSpec(memory_space=pltpu.MemorySpace.VMEM)


# ----------------------------------------------------------------------------
# In-kernel helpers (operate on arrays, not refs)
# ----------------------------------------------------------------------------
def _linear(h, w, b):
    # bf16 x bf16 MXU matmul, f32 accumulation; bias add in f32.
    return jnp.dot(h.astype(jnp.bfloat16), w,
                   preferred_element_type=jnp.float32) + b


def _fc(h, w, b, g, bl):
    # sigmoid(LayerNorm(h @ W + b)) -- fused FCLayer, single-pass LN stats.
    y = _linear(h, w, b)
    inv_n = 1.0 / y.shape[-1]
    mean = jnp.sum(y, axis=-1, keepdims=True) * inv_n
    meansq = jnp.sum(y * y, axis=-1, keepdims=True) * inv_n
    var = meansq - mean * mean                 # biased variance (torch LN)
    yhat = (y - mean) * jax.lax.rsqrt(var + LN_EPS)
    return jax.nn.sigmoid(yhat * g + bl)


def _fc_stack(h, refs4, n):
    """Apply n stacked (H->H) FCLayers stored as (n, ...) refs."""
    w_ref, b_ref, g_ref, bl_ref = refs4
    if n <= _UNROLL_MAX_HIDDEN:
        for i in range(n):                     # static unroll, static index
            h = _fc(h, w_ref[i][...], b_ref[i], g_ref[i], bl_ref[i])
        return h

    def body(i, hc):                           # bounded vreg live ranges
        return _fc(hc, w_ref[i], b_ref[i], g_ref[i], bl_ref[i])
    return jax.lax.fori_loop(0, n, body, h)


# ----------------------------------------------------------------------------
# Fused kernel: entire VAE forward in one body
# ----------------------------------------------------------------------------
def _vae_fused_kernel(*refs, n_enc_hidden, n_dec_hidden, latent, in_features,
                      beta, out_width):
    it = iter(refs)
    x_ref = next(it)
    eps_ref = next(it)
    enc_first = tuple(next(it) for _ in range(4))
    enc_hidden = tuple(next(it) for _ in range(4)) if n_enc_hidden else None
    wmu_ref, bmu_ref = next(it), next(it)
    wlv_ref, blv_ref = next(it), next(it)
    dec_first = tuple(next(it) for _ in range(4))
    dec_hidden = tuple(next(it) for _ in range(4)) if n_dec_hidden else None
    wo_ref, bo_ref = next(it), next(it)
    out_ref = next(it)

    x = x_ref[...].astype(jnp.float32)

    # ---- encoder -------------------------------------------------------
    w0, b0, g0, bl0 = enc_first
    h = _fc(x, w0[...], b0[...], g0[...], bl0[...])
    if n_enc_hidden:
        h = _fc_stack(h, enc_hidden, n_enc_hidden)

    h_bf = h.astype(jnp.bfloat16)
    mu = jnp.dot(h_bf, wmu_ref[...], preferred_element_type=jnp.float32) + bmu_ref[...]
    log_var = jnp.dot(h_bf, wlv_ref[...], preferred_element_type=jnp.float32) + blv_ref[...]

    # ---- reparameterize --------------------------------------------------
    std = jnp.exp(0.5 * log_var)
    sample = mu + eps_ref[...].astype(jnp.float32) * std

    # ---- decoder ---------------------------------------------------------
    wd0, bd0, gd0, bld0 = dec_first
    h = _fc(sample, wd0[...], bd0[...], gd0[...], bld0[...])
    if n_dec_hidden:
        h = _fc_stack(h, dec_hidden, n_dec_hidden)
    recon = jnp.dot(h.astype(jnp.bfloat16), wo_ref[...],
                    preferred_element_type=jnp.float32) + bo_ref[...]

    # ---- losses, packed into one lane-dense output slab ------------------
    diff = recon - x
    rl = jnp.sqrt(jnp.sum(diff * diff, axis=-1, keepdims=True))
    # exp(log_var) == std*std (reuse the EUP result from the reparam).
    kld = (-0.5 * beta) * (1.0 + log_var - mu * mu - std * std)

    B = x.shape[0]
    out_ref[:, :in_features] = recon.astype(out_ref.dtype)
    out_ref[:, in_features:in_features + 1] = rl.astype(out_ref.dtype)
    out_ref[:, in_features + 1:in_features + 1 + latent] = kld.astype(out_ref.dtype)
    pad = out_width - (in_features + 1 + latent)
    if pad > 0:
        out_ref[:, in_features + 1 + latent:] = jnp.zeros((B, pad), out_ref.dtype)


# ----------------------------------------------------------------------------
# Wrapper: ONE pallas_call for the whole forward pass
# ----------------------------------------------------------------------------
def vae_forward(params, x, eps, beta):
    B, Din = x.shape
    L = eps.shape[1]
    n_enc_hidden = 0 if params["enc_hidden"] is None else params["enc_hidden"][0].shape[0]
    n_dec_hidden = 0 if params["dec_hidden"] is None else params["dec_hidden"][0].shape[0]

    packed_w = Din + 1 + L
    out_width = max(128, ((packed_w + 127) // 128) * 128)   # lane-dense slab

    flat_inputs = [x, eps]
    flat_inputs.extend(params["enc_first"])
    if n_enc_hidden:
        flat_inputs.extend(params["enc_hidden"])
    flat_inputs.extend(params["enc_mu"])
    flat_inputs.extend(params["enc_logvar"])
    flat_inputs.extend(params["dec_first"])
    if n_dec_hidden:
        flat_inputs.extend(params["dec_hidden"])
    flat_inputs.extend(params["dec_out"])

    kernel = functools.partial(
        _vae_fused_kernel,
        n_enc_hidden=n_enc_hidden, n_dec_hidden=n_dec_hidden,
        latent=L, in_features=Din, beta=float(beta), out_width=out_width)

    slab = pl.pallas_call(
        kernel,
        out_shape=jax.ShapeDtypeStruct((B, out_width), jnp.float32),
        in_specs=[_VMEM_SPEC] * len(flat_inputs),
        out_specs=_VMEM_SPEC,
        compiler_params=pltpu.CompilerParams(vmem_limit_bytes=32 * 1024 * 1024),
    )(*flat_inputs)

    recon = slab[:, :Din].astype(x.dtype)
    recon_loss = slab[:, Din].astype(x.dtype)
    kld = slab[:, Din + 1:Din + 1 + L].astype(x.dtype)
    return recon, recon_loss, kld


# ----------------------------------------------------------------------------
# Deterministic parameter initialization (PyTorch-default shapes, transposed;
# matmul weights stored bf16, biases / LayerNorm params f32).
# ----------------------------------------------------------------------------
def _init_linear(key, d_in, d_out):
    kw, kb = jax.random.split(key)
    bound = 1.0 / jnp.sqrt(jnp.float32(d_in))
    w = jax.random.uniform(kw, (d_in, d_out), jnp.float32, -bound, bound)
    b = jax.random.uniform(kb, (1, d_out), jnp.float32, -bound, bound)
    return w.astype(jnp.bfloat16), b


def _init_fc_layer(key, d_in, d_out):
    w, b = _init_linear(key, d_in, d_out)
    gamma = jnp.ones((1, d_out), jnp.float32)   # LayerNorm weight
    beta = jnp.zeros((1, d_out), jnp.float32)   # LayerNorm bias
    return (w, b, gamma, beta)


def _stack_fc_layers(layers):
    ws = jnp.stack([l[0] for l in layers])   # (n, H, H)  bf16
    bs = jnp.stack([l[1] for l in layers])   # (n, 1, H)  f32
    gs = jnp.stack([l[2] for l in layers])
    bls = jnp.stack([l[3] for l in layers])
    return (ws, bs, gs, bls)


def init_vae_params(key, in_features, num_hidden_layers, hidden_ch, latent_features):
    keys = jax.random.split(key, 2 * num_hidden_layers + 4)
    ki = iter(keys)
    enc_first = _init_fc_layer(next(ki), in_features, hidden_ch)
    enc_hidden = [_init_fc_layer(next(ki), hidden_ch, hidden_ch)
                  for _ in range(num_hidden_layers)]
    w_eo, b_eo = _init_linear(next(ki), hidden_ch, 2 * latent_features)
    enc_mu = (w_eo[:, :latent_features], b_eo[:, :latent_features])
    enc_logvar = (w_eo[:, latent_features:], b_eo[:, latent_features:])

    dec_first = _init_fc_layer(next(ki), latent_features, hidden_ch)
    dec_hidden = [_init_fc_layer(next(ki), hidden_ch, hidden_ch)
                  for _ in range(num_hidden_layers)]
    dec_out = _init_linear(next(ki), hidden_ch, in_features)

    return {
        "enc_first": enc_first,
        "enc_hidden": _stack_fc_layers(enc_hidden) if enc_hidden else None,
        "enc_mu": enc_mu,
        "enc_logvar": enc_logvar,
        "dec_first": dec_first,
        "dec_hidden": _stack_fc_layers(dec_hidden) if dec_hidden else None,
        "dec_out": dec_out,
    }


if __name__ == "__main__":
    # Small shapes consistent with the module (hidden_ch matches the 128 default).
    batch = 8
    in_features = 32
    num_hidden_layers = 2
    hidden_ch = 128
    latent_features = 5
    beta = 10.0

    root = jax.random.PRNGKey(0)
    k_params, k_x, k_eps = jax.random.split(root, 3)

    params = init_vae_params(k_params, in_features, num_hidden_layers,
                             hidden_ch, latent_features)
    x = jax.random.normal(k_x, (batch, in_features), jnp.float32)
    # torch.randn_like(std) equivalent (explicit input for determinism).
    eps = jax.random.normal(k_eps, (batch, latent_features), jnp.float32)

    fwd = jax.jit(functools.partial(vae_forward, beta=beta))
    recon, recon_loss, kld_loss = fwd(params, x, eps)
    jax.block_until_ready((recon, recon_loss, kld_loss))

    assert recon.shape == (batch, in_features)
    assert recon_loss.shape == (batch,)
    assert kld_loss.shape == (batch, latent_features)
    assert jnp.all(jnp.isfinite(recon))
    assert jnp.all(jnp.isfinite(recon_loss))
    assert jnp.all(jnp.isfinite(kld_loss))

    # Sanity-check against a pure-JAX reference of the same math
    # (same bf16 weight / activation casts, f32 accumulation).
    def ref_forward(params, x, eps, beta):
        def lin(h, w, b):
            return jnp.dot(h.astype(jnp.bfloat16), w,
                           preferred_element_type=jnp.float32) + b

        def fc(h, w, b, g, bl):
            y = lin(h, w, b)
            m = jnp.mean(y, -1, keepdims=True)
            v = jnp.mean(y * y, -1, keepdims=True) - m * m
            return jax.nn.sigmoid((y - m) * jax.lax.rsqrt(v + LN_EPS) * g + bl)

        h = fc(x, *params["enc_first"])
        if params["enc_hidden"] is not None:
            ws, bs, gs, bls = params["enc_hidden"]
            for i in range(ws.shape[0]):
                h = fc(h, ws[i], bs[i], gs[i], bls[i])
        mu = lin(h, *params["enc_mu"])
        lv = lin(h, *params["enc_logvar"])
        std = jnp.exp(0.5 * lv)
        s = mu + eps * std
        h = fc(s, *params["dec_first"])
        if params["dec_hidden"] is not None:
            ws, bs, gs, bls = params["dec_hidden"]
            for i in range(ws.shape[0]):
                h = fc(h, ws[i], bs[i], gs[i], bls[i])
        rec = lin(h, *params["dec_out"])
        rl = jnp.linalg.norm(rec - x, axis=1)
        kld = beta * (-0.5) * (1 + lv - mu ** 2 - std * std)
        return rec, rl, kld

    r_ref, rl_ref_v, k_ref = ref_forward(params, x, eps, beta)
    assert jnp.allclose(recon, r_ref, atol=2e-3, rtol=2e-3)
    assert jnp.allclose(recon_loss, rl_ref_v, atol=2e-3, rtol=2e-3)
    assert jnp.allclose(kld_loss, k_ref, atol=2e-3, rtol=2e-3)

    print("KERNEL_OK")
</pallas_src>

<mosaic_0001>
module attributes {stable_mosaic.version = 11 : i64} {
  func.func @_vae_fused_kernel(%arg0: memref<8x32xf32, #tpu.memory_space<vmem>>, %arg1: memref<8x5xf32, #tpu.memory_space<vmem>>, %arg2: memref<32x128xbf16, #tpu.memory_space<vmem>>, %arg3: memref<1x128xf32, #tpu.memory_space<vmem>>, %arg4: memref<1x128xf32, #tpu.memory_space<vmem>>, %arg5: memref<1x128xf32, #tpu.memory_space<vmem>>, %arg6: memref<2x128x128xbf16, #tpu.memory_space<vmem>>, %arg7: memref<2x1x128xf32, #tpu.memory_space<vmem>>, %arg8: memref<2x1x128xf32, #tpu.memory_space<vmem>>, %arg9: memref<2x1x128xf32, #tpu.memory_space<vmem>>, %arg10: memref<128x5xbf16, #tpu.memory_space<vmem>>, %arg11: memref<1x5xf32, #tpu.memory_space<vmem>>, %arg12: memref<128x5xbf16, #tpu.memory_space<vmem>>, %arg13: memref<1x5xf32, #tpu.memory_space<vmem>>, %arg14: memref<5x128xbf16, #tpu.memory_space<vmem>>, %arg15: memref<1x128xf32, #tpu.memory_space<vmem>>, %arg16: memref<1x128xf32, #tpu.memory_space<vmem>>, %arg17: memref<1x128xf32, #tpu.memory_space<vmem>>, %arg18: memref<2x128x128xbf16, #tpu.memory_space<vmem>>, %arg19: memref<2x1x128xf32, #tpu.memory_space<vmem>>, %arg20: memref<2x1x128xf32, #tpu.memory_space<vmem>>, %arg21: memref<2x1x128xf32, #tpu.memory_space<vmem>>, %arg22: memref<128x32xbf16, #tpu.memory_space<vmem>>, %arg23: memref<1x32xf32, #tpu.memory_space<vmem>>, %arg24: memref<8x128xf32, #tpu.memory_space<vmem>>) attributes {dimension_semantics = [], scalar_prefetch = 0 : i64, scratch_operands = 0 : i64, tpu.core_type = #tpu.core_type<tc>} {
    %c0 = arith.constant 0 : index
    %c0_0 = arith.constant 0 : index
    %0 = vector.load %arg0[%c0, %c0_0] : memref<8x32xf32, #tpu.memory_space<vmem>>, vector<8x32xf32>
    %c0_1 = arith.constant 0 : index
    %c0_2 = arith.constant 0 : index
    %1 = vector.load %arg2[%c0_1, %c0_2] : memref<32x128xbf16, #tpu.memory_space<vmem>>, vector<32x128xbf16>
    %c0_3 = arith.constant 0 : index
    %c0_4 = arith.constant 0 : index
    %2 = vector.load %arg3[%c0_3, %c0_4] : memref<1x128xf32, #tpu.memory_space<vmem>>, vector<1x128xf32>
    %c0_5 = arith.constant 0 : index
    %c0_6 = arith.constant 0 : index
    %3 = vector.load %arg4[%c0_5, %c0_6] : memref<1x128xf32, #tpu.memory_space<vmem>>, vector<1x128xf32>
    %c0_7 = arith.constant 0 : index
    %c0_8 = arith.constant 0 : index
    %4 = vector.load %arg5[%c0_7, %c0_8] : memref<1x128xf32, #tpu.memory_space<vmem>>, vector<1x128xf32>
    %5 = arith.truncf %0 : vector<8x32xf32> to vector<8x32xbf16>
    %cst = arith.constant dense<0.000000e+00> : vector<8x128xf32>
    %6 = tpu.matmul %5, %1, %cst {dimension_numbers = #tpu.dot_dimension_numbers<[1], [0], [0], [1], [0, 0, 1, 1], [], []>} : vector<8x32xbf16>, vector<32x128xbf16>, vector<8x128xf32> -> vector<8x128xf32>
    %7 = vector.broadcast %2 : vector<1x128xf32> to vector<8x128xf32>
    %8 = arith.addf %6, %7 : vector<8x128xf32>
    %cst_9 = arith.constant dense<0.000000e+00> : vector<8xf32>
    %9 = vector.multi_reduction <add>, %8, %cst_9 [1] : vector<8x128xf32> to vector<8xf32>
    %10 = vector.shape_cast %9 : vector<8xf32> to vector<8x1xf32>
    %cst_10 = arith.constant 7.812500e-03 : f32
    %11 = vector.broadcast %cst_10 : f32 to vector<8x1xf32>
    %12 = arith.mulf %10, %11 : vector<8x1xf32>
    %13 = arith.mulf %8, %8 : vector<8x128xf32>
    %cst_11 = arith.constant dense<0.000000e+00> : vector<8xf32>
    %14 = vector.multi_reduction <add>, %13, %cst_11 [1] : vector<8x128xf32> to vector<8xf32>
    %15 = vector.shape_cast %14 : vector<8xf32> to vector<8x1xf32>
    %cst_12 = arith.constant 7.812500e-03 : f32
    %16 = vector.broadcast %cst_12 : f32 to vector<8x1xf32>
    %17 = arith.mulf %15, %16 : vector<8x1xf32>
    %18 = arith.mulf %12, %12 : vector<8x1xf32>
    %19 = arith.subf %17, %18 : vector<8x1xf32>
    %20 = vector.broadcast %12 : vector<8x1xf32> to vector<8x128xf32>
    %21 = arith.subf %8, %20 : vector<8x128xf32>
    %cst_13 = arith.constant 9.99999974E-6 : f32
    %22 = vector.broadcast %cst_13 : f32 to vector<8x1xf32>
    %23 = arith.addf %19, %22 : vector<8x1xf32>
    %24 = math.rsqrt %23 : vector<8x1xf32>
    %25 = vector.broadcast %24 : vector<8x1xf32> to vector<8x128xf32>
    %26 = arith.mulf %21, %25 : vector<8x128xf32>
    %27 = vector.broadcast %3 : vector<1x128xf32> to vector<8x128xf32>
    %28 = arith.mulf %26, %27 : vector<8x128xf32>
    %29 = vector.broadcast %4 : vector<1x128xf32> to vector<8x128xf32>
    %30 = arith.addf %28, %29 : vector<8x128xf32>
    %31 = arith.negf %30 : vector<8x128xf32>
    %32 = math.exp %31 : vector<8x128xf32>
    %cst_14 = arith.constant 1.000000e+00 : f32
    %33 = vector.broadcast %cst_14 : f32 to vector<8x128xf32>
    %34 = arith.addf %33, %32 : vector<8x128xf32>
    %35 = arith.divf %33, %34 : vector<8x128xf32>
    %c0_15 = arith.constant 0 : index
    %c0_16 = arith.constant 0 : index
    %c0_17 = arith.constant 0 : index
    %36 = vector.load %arg6[%c0_15, %c0_16, %c0_17] : memref<2x128x128xbf16, #tpu.memory_space<vmem>>, vector<1x128x128xbf16>
    %37 = vector.shape_cast %36 : vector<1x128x128xbf16> to vector<128x128xbf16>
    %c0_18 = arith.constant 0 : index
    %c0_19 = arith.constant 0 : index
    %c0_20 = arith.constant 0 : index
    %38 = vector.load %arg7[%c0_18, %c0_19, %c0_20] : memref<2x1x128xf32, #tpu.memory_space<vmem>>, vector<1x1x128xf32>
    %39 = vector.shape_cast %38 : vector<1x1x128xf32> to vector<1x128xf32>
    %c0_21 = arith.constant 0 : index
    %c0_22 = arith.constant 0 : index
    %c0_23 = arith.constant 0 : index
    %40 = vector.load %arg8[%c0_21, %c0_22, %c0_23] : memref<2x1x128xf32, #tpu.memory_space<vmem>>, vector<1x1x128xf32>
    %41 = vector.shape_cast %40 : vector<1x1x128xf32> to vector<1x128xf32>
    %c0_24 = arith.constant 0 : index
    %c0_25 = arith.constant 0 : index
    %c0_26 = arith.constant 0 : index
    %42 = vector.load %arg9[%c0_24, %c0_25, %c0_26] : memref<2x1x128xf32, #tpu.memory_space<vmem>>, vector<1x1x128xf32>
    %43 = vector.shape_cast %42 : vector<1x1x128xf32> to vector<1x128xf32>
    %44 = arith.truncf %35 : vector<8x128xf32> to vector<8x128xbf16>
    %cst_27 = arith.constant dense<0.000000e+00> : vector<8x128xf32>
    %45 = tpu.matmul %44, %37, %cst_27 {dimension_numbers = #tpu.dot_dimension_numbers<[1], [0], [0], [1], [0, 0, 1, 1], [], []>} : vector<8x128xbf16>, vector<128x128xbf16>, vector<8x128xf32> -> vector<8x128xf32>
    %46 = vector.broadcast %39 : vector<1x128xf32> to vector<8x128xf32>
    %47 = arith.addf %45, %46 : vector<8x128xf32>
    %cst_28 = arith.constant dense<0.000000e+00> : vector<8xf32>
    %48 = vector.multi_reduction <add>, %47, %cst_28 [1] : vector<8x128xf32> to vector<8xf32>
    %49 = vector.shape_cast %48 : vector<8xf32> to vector<8x1xf32>
    %cst_29 = arith.constant 7.812500e-03 : f32
    %50 = vector.broadcast %cst_29 : f32 to vector<8x1xf32>
    %51 = arith.mulf %49, %50 : vector<8x1xf32>
    %52 = arith.mulf %47, %47 : vector<8x128xf32>
    %cst_30 = arith.constant dense<0.000000e+00> : vector<8xf32>
    %53 = vector.multi_reduction <add>, %52, %cst_30 [1] : vector<8x128xf32> to vector<8xf32>
    %54 = vector.shape_cast %53 : vector<8xf32> to vector<8x1xf32>
    %cst_31 = arith.constant 7.812500e-03 : f32
    %55 = vector.broadcast %cst_31 : f32 to vector<8x1xf32>
    %56 = arith.mulf %54, %55 : vector<8x1xf32>
    %57 = arith.mulf %51, %51 : vector<8x1xf32>
    %58 = arith.subf %56, %57 : vector<8x1xf32>
    %59 = vector.broadcast %51 : vector<8x1xf32> to vector<8x128xf32>
    %60 = arith.subf %47, %59 : vector<8x128xf32>
    %cst_32 = arith.constant 9.99999974E-6 : f32
    %61 = vector.broadcast %cst_32 : f32 to vector<8x1xf32>
    %62 = arith.addf %58, %61 : vector<8x1xf32>
    %63 = math.rsqrt %62 : vector<8x1xf32>
    %64 = vector.broadcast %63 : vector<8x1xf32> to vector<8x128xf32>
    %65 = arith.mulf %60, %64 : vector<8x128xf32>
    %66 = vector.broadcast %41 : vector<1x128xf32> to vector<8x128xf32>
    %67 = arith.mulf %65, %66 : vector<8x128xf32>
    %68 = vector.broadcast %43 : vector<1x128xf32> to vector<8x128xf32>
    %69 = arith.addf %67, %68 : vector<8x128xf32>
    %70 = arith.negf %69 : vector<8x128xf32>
    %71 = math.exp %70 : vector<8x128xf32>
    %cst_33 = arith.constant 1.000000e+00 : f32
    %72 = vector.broadcast %cst_33 : f32 to vector<8x128xf32>
    %73 = arith.addf %72, %71 : vector<8x128xf32>
    %74 = arith.divf %72, %73 : vector<8x128xf32>
    %c1 = arith.constant 1 : index
    %c0_34 = arith.constant 0 : index
    %c0_35 = arith.constant 0 : index
    %75 = vector.load %arg6[%c1, %c0_34, %c0_35] : memref<2x128x128xbf16, #tpu.memory_space<vmem>>, vector<1x128x128xbf16>
    %76 = vector.shape_cast %75 : vector<1x128x128xbf16> to vector<128x128xbf16>
    %c1_36 = arith.constant 1 : index
    %c0_37 = arith.constant 0 : index
    %c0_38 = arith.constant 0 : index
    %77 = vector.load %arg7[%c1_36, %c0_37, %c0_38] : memref<2x1x128xf32, #tpu.memory_space<vmem>>, vector<1x1x128xf32>
    %78 = vector.shape_cast %77 : vector<1x1x128xf32> to vector<1x128xf32>
    %c1_39 = arith.constant 1 : index
    %c0_40 = arith.constant 0 : index
    %c0_41 = arith.constant 0 : index
    %79 = vector.load %arg8[%c1_39, %c0_40, %c0_41] : memref<2x1x128xf32, #tpu.memory_space<vmem>>, vector<1x1x128xf32>
    %80 = vector.shape_cast %79 : vector<1x1x128xf32> to vector<1x128xf32>
    %c1_42 = arith.constant 1 : index
    %c0_43 = arith.constant 0 : index
    %c0_44 = arith.constant 0 : index
    %81 = vector.load %arg9[%c1_42, %c0_43, %c0_44] : memref<2x1x128xf32, #tpu.memory_space<vmem>>, vector<1x1x128xf32>
    %82 = vector.shape_cast %81 : vector<1x1x128xf32> to vector<1x128xf32>
    %83 = arith.truncf %74 : vector<8x128xf32> to vector<8x128xbf16>
    %cst_45 = arith.constant dense<0.000000e+00> : vector<8x128xf32>
    %84 = tpu.matmul %83, %76, %cst_45 {dimension_numbers = #tpu.dot_dimension_numbers<[1], [0], [0], [1], [0, 0, 1, 1], [], []>} : vector<8x128xbf16>, vector<128x128xbf16>, vector<8x128xf32> -> vector<8x128xf32>
    %85 = vector.broadcast %78 : vector<1x128xf32> to vector<8x128xf32>
    %86 = arith.addf %84, %85 : vector<8x128xf32>
    %cst_46 = arith.constant dense<0.000000e+00> : vector<8xf32>
    %87 = vector.multi_reduction <add>, %86, %cst_46 [1] : vector<8x128xf32> to vector<8xf32>
    %88 = vector.shape_cast %87 : vector<8xf32> to vector<8x1xf32>
    %cst_47 = arith.constant 7.812500e-03 : f32
    %89 = vector.broadcast %cst_47 : f32 to vector<8x1xf32>
    %90 = arith.mulf %88, %89 : vector<8x1xf32>
    %91 = arith.mulf %86, %86 : vector<8x128xf32>
    %cst_48 = arith.constant dense<0.000000e+00> : vector<8xf32>
    %92 = vector.multi_reduction <add>, %91, %cst_48 [1] : vector<8x128xf32> to vector<8xf32>
    %93 = vector.shape_cast %92 : vector<8xf32> to vector<8x1xf32>
    %cst_49 = arith.constant 7.812500e-03 : f32
    %94 = vector.broadcast %cst_49 : f32 to vector<8x1xf32>
    %95 = arith.mulf %93, %94 : vector<8x1xf32>
    %96 = arith.mulf %90, %90 : vector<8x1xf32>
    %97 = arith.subf %95, %96 : vector<8x1xf32>
    %98 = vector.broadcast %90 : vector<8x1xf32> to vector<8x128xf32>
    %99 = arith.subf %86, %98 : vector<8x128xf32>
    %cst_50 = arith.constant 9.99999974E-6 : f32
    %100 = vector.broadcast %cst_50 : f32 to vector<8x1xf32>
    %101 = arith.addf %97, %100 : vector<8x1xf32>
    %102 = math.rsqrt %101 : vector<8x1xf32>
    %103 = vector.broadcast %102 : vector<8x1xf32> to vector<8x128xf32>
    %104 = arith.mulf %99, %103 : vector<8x128xf32>
    %105 = vector.broadcast %80 : vector<1x128xf32> to vector<8x128xf32>
    %106 = arith.mulf %104, %105 : vector<8x128xf32>
    %107 = vector.broadcast %82 : vector<1x128xf32> to vector<8x128xf32>
    %108 = arith.addf %106, %107 : vector<8x128xf32>
    %109 = arith.negf %108 : vector<8x128xf32>
    %110 = math.exp %109 : vector<8x128xf32>
    %cst_51 = arith.constant 1.000000e+00 : f32
    %111 = vector.broadcast %cst_51 : f32 to vector<8x128xf32>
    %112 = arith.addf %111, %110 : vector<8x128xf32>
    %113 = arith.divf %111, %112 : vector<8x128xf32>
    %114 = arith.truncf %113 : vector<8x128xf32> to vector<8x128xbf16>
    %c0_52 = arith.constant 0 : index
    %c0_53 = arith.constant 0 : index
    %115 = vector.load %arg10[%c0_52, %c0_53] : memref<128x5xbf16, #tpu.memory_space<vmem>>, vector<128x5xbf16>
    %cst_54 = arith.constant dense<0.000000e+00> : vector<8x5xf32>
    %116 = tpu.matmul %114, %115, %cst_54 {dimension_numbers = #tpu.dot_dimension_numbers<[1], [0], [0], [1], [0, 0, 1, 1], [], []>} : vector<8x128xbf16>, vector<128x5xbf16>, vector<8x5xf32> -> vector<8x5xf32>
    %c0_55 = arith.constant 0 : index
    %c0_56 = arith.constant 0 : index
    %117 = vector.load %arg11[%c0_55, %c0_56] : memref<1x5xf32, #tpu.memory_space<vmem>>, vector<1x5xf32>
    %118 = vector.broadcast %117 : vector<1x5xf32> to vector<8x5xf32>
    %119 = arith.addf %116, %118 : vector<8x5xf32>
    %c0_57 = arith.constant 0 : index
    %c0_58 = arith.constant 0 : index
    %120 = vector.load %arg12[%c0_57, %c0_58] : memref<128x5xbf16, #tpu.memory_space<vmem>>, vector<128x5xbf16>
    %cst_59 = arith.constant dense<0.000000e+00> : vector<8x5xf32>
    %121 = tpu.matmul %114, %120, %cst_59 {dimension_numbers = #tpu.dot_dimension_numbers<[1], [0], [0], [1], [0, 0, 1, 1], [], []>} : vector<8x128xbf16>, vector<128x5xbf16>, vector<8x5xf32> -> vector<8x5xf32>
    %c0_60 = arith.constant 0 : index
    %c0_61 = arith.constant 0 : index
    %122 = vector.load %arg13[%c0_60, %c0_61] : memref<1x5xf32, #tpu.memory_space<vmem>>, vector<1x5xf32>
    %123 = vector.broadcast %122 : vector<1x5xf32> to vector<8x5xf32>
    %124 = arith.addf %121, %123 : vector<8x5xf32>
    %cst_62 = arith.constant 5.000000e-01 : f32
    %125 = vector.broadcast %cst_62 : f32 to vector<8x5xf32>
    %126 = arith.mulf %125, %124 : vector<8x5xf32>
    %127 = math.exp %126 : vector<8x5xf32>
    %c0_63 = arith.constant 0 : index
    %c0_64 = arith.constant 0 : index
    %128 = vector.load %arg1[%c0_63, %c0_64] : memref<8x5xf32, #tpu.memory_space<vmem>>, vector<8x5xf32>
    %129 = arith.mulf %128, %127 : vector<8x5xf32>
    %130 = arith.addf %119, %129 : vector<8x5xf32>
    %c0_65 = arith.constant 0 : index
    %c0_66 = arith.constant 0 : index
    %131 = vector.load %arg14[%c0_65, %c0_66] : memref<5x128xbf16, #tpu.memory_space<vmem>>, vector<5x128xbf16>
    %c0_67 = arith.constant 0 : index
    %c0_68 = arith.constant 0 : index
    %132 = vector.load %arg15[%c0_67, %c0_68] : memref<1x128xf32, #tpu.memory_space<vmem>>, vector<1x128xf32>
    %c0_69 = arith.constant 0 : index
    %c0_70 = arith.constant 0 : index
    %133 = vector.load %arg16[%c0_69, %c0_70] : memref<1x128xf32, #tpu.memory_space<vmem>>, vector<1x128xf32>
    %c0_71 = arith.constant 0 : index
    %c0_72 = arith.constant 0 : index
    %134 = vector.load %arg17[%c0_71, %c0_72] : memref<1x128xf32, #tpu.memory_space<vmem>>, vector<1x128xf32>
    %135 = arith.truncf %130 : vector<8x5xf32> to vector<8x5xbf16>
    %cst_73 = arith.constant dense<0.000000e+00> : vector<8x128xf32>
    %136 = tpu.matmul %135, %131, %cst_73 {dimension_numbers = #tpu.dot_dimension_numbers<[1], [0], [0], [1], [0, 0, 1, 1], [], []>} : vector<8x5xbf16>, vector<5x128xbf16>, vector<8x128xf32> -> vector<8x128xf32>
    %137 = vector.broadcast %132 : vector<1x128xf32> to vector<8x128xf32>
    %138 = arith.addf %136, %137 : vector<8x128xf32>
    %cst_74 = arith.constant dense<0.000000e+00> : vector<8xf32>
    %139 = vector.multi_reduction <add>, %138, %cst_74 [1] : vector<8x128xf32> to vector<8xf32>
    %140 = vector.shape_cast %139 : vector<8xf32> to vector<8x1xf32>
    %cst_75 = arith.constant 7.812500e-03 : f32
    %141 = vector.broadcast %cst_75 : f32 to vector<8x1xf32>
    %142 = arith.mulf %140, %141 : vector<8x1xf32>
    %143 = arith.mulf %138, %138 : vector<8x128xf32>
    %cst_76 = arith.constant dense<0.000000e+00> : vector<8xf32>
    %144 = vector.multi_reduction <add>, %143, %cst_76 [1] : vector<8x128xf32> to vector<8xf32>
    %145 = vector.shape_cast %144 : vector<8xf32> to vector<8x1xf32>
    %cst_77 = arith.constant 7.812500e-03 : f32
    %146 = vector.broadcast %cst_77 : f32 to vector<8x1xf32>
    %147 = arith.mulf %145, %146 : vector<8x1xf32>
    %148 = arith.mulf %142, %142 : vector<8x1xf32>
    %149 = arith.subf %147, %148 : vector<8x1xf32>
    %150 = vector.broadcast %142 : vector<8x1xf32> to vector<8x128xf32>
    %151 = arith.subf %138, %150 : vector<8x128xf32>
    %cst_78 = arith.constant 9.99999974E-6 : f32
    %152 = vector.broadcast %cst_78 : f32 to vector<8x1xf32>
    %153 = arith.addf %149, %152 : vector<8x1xf32>
    %154 = math.rsqrt %153 : vector<8x1xf32>
    %155 = vector.broadcast %154 : vector<8x1xf32> to vector<8x128xf32>
    %156 = arith.mulf %151, %155 : vector<8x128xf32>
    %157 = vector.broadcast %133 : vector<1x128xf32> to vector<8x128xf32>
    %158 = arith.mulf %156, %157 : vector<8x128xf32>
    %159 = vector.broadcast %134 : vector<1x128xf32> to vector<8x128xf32>
    %160 = arith.addf %158, %159 : vector<8x128xf32>
    %161 = arith.negf %160 : vector<8x128xf32>
    %162 = math.exp %161 : vector<8x128xf32>
    %cst_79 = arith.constant 1.000000e+00 : f32
    %163 = vector.broadcast %cst_79 : f32 to vector<8x128xf32>
    %164 = arith.addf %163, %162 : vector<8x128xf32>
    %165 = arith.divf %163, %164 : vector<8x128xf32>
    %c0_80 = arith.constant 0 : index
    %c0_81 = arith.constant 0 : index
    %c0_82 = arith.constant 0 : index
    %166 = vector.load %arg18[%c0_80, %c0_81, %c0_82] : memref<2x128x128xbf16, #tpu.memory_space<vmem>>, vector<1x128x128xbf16>
    %167 = vector.shape_cast %166 : vector<1x128x128xbf16> to vector<128x128xbf16>
    %c0_83 = arith.constant 0 : index
    %c0_84 = arith.constant 0 : index
    %c0_85 = arith.constant 0 : index
    %168 = vector.load %arg19[%c0_83, %c0_84, %c0_85] : memref<2x1x128xf32, #tpu.memory_space<vmem>>, vector<1x1x128xf32>
    %169 = vector.shape_cast %168 : vector<1x1x128xf32> to vector<1x128xf32>
    %c0_86 = arith.constant 0 : index
    %c0_87 = arith.constant 0 : index
    %c0_88 = arith.constant 0 : index
    %170 = vector.load %arg20[%c0_86, %c0_87, %c0_88] : memref<2x1x128xf32, #tpu.memory_space<vmem>>, vector<1x1x128xf32>
    %171 = vector.shape_cast %170 : vector<1x1x128xf32> to vector<1x128xf32>
    %c0_89 = arith.constant 0 : index
    %c0_90 = arith.constant 0 : index
    %c0_91 = arith.constant 0 : index
    %172 = vector.load %arg21[%c0_89, %c0_90, %c0_91] : memref<2x1x128xf32, #tpu.memory_space<vmem>>, vector<1x1x128xf32>
    %173 = vector.shape_cast %172 : vector<1x1x128xf32> to vector<1x128xf32>
    %174 = arith.truncf %165 : vector<8x128xf32> to vector<8x128xbf16>
    %cst_92 = arith.constant dense<0.000000e+00> : vector<8x128xf32>
    %175 = tpu.matmul %174, %167, %cst_92 {dimension_numbers = #tpu.dot_dimension_numbers<[1], [0], [0], [1], [0, 0, 1, 1], [], []>} : vector<8x128xbf16>, vector<128x128xbf16>, vector<8x128xf32> -> vector<8x128xf32>
    %176 = vector.broadcast %169 : vector<1x128xf32> to vector<8x128xf32>
    %177 = arith.addf %175, %176 : vector<8x128xf32>
    %cst_93 = arith.constant dense<0.000000e+00> : vector<8xf32>
    %178 = vector.multi_reduction <add>, %177, %cst_93 [1] : vector<8x128xf32> to vector<8xf32>
    %179 = vector.shape_cast %178 : vector<8xf32> to vector<8x1xf32>
    %cst_94 = arith.constant 7.812500e-03 : f32
    %180 = vector.broadcast %cst_94 : f32 to vector<8x1xf32>
    %181 = arith.mulf %179, %180 : vector<8x1xf32>
    %182 = arith.mulf %177, %177 : vector<8x128xf32>
    %cst_95 = arith.constant dense<0.000000e+00> : vector<8xf32>
    %183 = vector.multi_reduction <add>, %182, %cst_95 [1] : vector<8x128xf32> to vector<8xf32>
    %184 = vector.shape_cast %183 : vector<8xf32> to vector<8x1xf32>
    %cst_96 = arith.constant 7.812500e-03 : f32
    %185 = vector.broadcast %cst_96 : f32 to vector<8x1xf32>
    %186 = arith.mulf %184, %185 : vector<8x1xf32>
    %187 = arith.mulf %181, %181 : vector<8x1xf32>
    %188 = arith.subf %186, %187 : vector<8x1xf32>
    %189 = vector.broadcast %181 : vector<8x1xf32> to vector<8x128xf32>
    %190 = arith.subf %177, %189 : vector<8x128xf32>
    %cst_97 = arith.constant 9.99999974E-6 : f32
    %191 = vector.broadcast %cst_97 : f32 to vector<8x1xf32>
    %192 = arith.addf %188, %191 : vector<8x1xf32>
    %193 = math.rsqrt %192 : vector<8x1xf32>
    %194 = vector.broadcast %193 : vector<8x1xf32> to vector<8x128xf32>
    %195 = arith.mulf %190, %194 : vector<8x128xf32>
    %196 = vector.broadcast %171 : vector<1x128xf32> to vector<8x128xf32>
    %197 = arith.mulf %195, %196 : vector<8x128xf32>
    %198 = vector.broadcast %173 : vector<1x128xf32> to vector<8x128xf32>
    %199 = arith.addf %197, %198 : vector<8x128xf32>
    %200 = arith.negf %199 : vector<8x128xf32>
    %201 = math.exp %200 : vector<8x128xf32>
    %cst_98 = arith.constant 1.000000e+00 : f32
    %202 = vector.broadcast %cst_98 : f32 to vector<8x128xf32>
    %203 = arith.addf %202, %201 : vector<8x128xf32>
    %204 = arith.divf %202, %203 : vector<8x128xf32>
    %c1_99 = arith.constant 1 : index
    %c0_100 = arith.constant 0 : index
    %c0_101 = arith.constant 0 : index
    %205 = vector.load %arg18[%c1_99, %c0_100, %c0_101] : memref<2x128x128xbf16, #tpu.memory_space<vmem>>, vector<1x128x128xbf16>
    %206 = vector.shape_cast %205 : vector<1x128x128xbf16> to vector<128x128xbf16>
    %c1_102 = arith.constant 1 : index
    %c0_103 = arith.constant 0 : index
    %c0_104 = arith.constant 0 : index
    %207 = vector.load %arg19[%c1_102, %c0_103, %c0_104] : memref<2x1x128xf32, #tpu.memory_space<vmem>>, vector<1x1x128xf32>
    %208 = vector.shape_cast %207 : vector<1x1x128xf32> to vector<1x128xf32>
    %c1_105 = arith.constant 1 : index
    %c0_106 = arith.constant 0 : index
    %c0_107 = arith.constant 0 : index
    %209 = vector.load %arg20[%c1_105, %c0_106, %c0_107] : memref<2x1x128xf32, #tpu.memory_space<vmem>>, vector<1x1x128xf32>
    %210 = vector.shape_cast %209 : vector<1x1x128xf32> to vector<1x128xf32>
    %c1_108 = arith.constant 1 : index
    %c0_109 = arith.constant 0 : index
    %c0_110 = arith.constant 0 : index
    %211 = vector.load %arg21[%c1_108, %c0_109, %c0_110] : memref<2x1x128xf32, #tpu.memory_space<vmem>>, vector<1x1x128xf32>
    %212 = vector.shape_cast %211 : vector<1x1x128xf32> to vector<1x128xf32>
    %213 = arith.truncf %204 : vector<8x128xf32> to vector<8x128xbf16>
    %cst_111 = arith.constant dense<0.000000e+00> : vector<8x128xf32>
    %214 = tpu.matmul %213, %206, %cst_111 {dimension_numbers = #tpu.dot_dimension_numbers<[1], [0], [0], [1], [0, 0, 1, 1], [], []>} : vector<8x128xbf16>, vector<128x128xbf16>, vector<8x128xf32> -> vector<8x128xf32>
    %215 = vector.broadcast %208 : vector<1x128xf32> to vector<8x128xf32>
    %216 = arith.addf %214, %215 : vector<8x128xf32>
    %cst_112 = arith.constant dense<0.000000e+00> : vector<8xf32>
    %217 = vector.multi_reduction <add>, %216, %cst_112 [1] : vector<8x128xf32> to vector<8xf32>
    %218 = vector.shape_cast %217 : vector<8xf32> to vector<8x1xf32>
    %cst_113 = arith.constant 7.812500e-03 : f32
    %219 = vector.broadcast %cst_113 : f32 to vector<8x1xf32>
    %220 = arith.mulf %218, %219 : vector<8x1xf32>
    %221 = arith.mulf %216, %216 : vector<8x128xf32>
    %cst_114 = arith.constant dense<0.000000e+00> : vector<8xf32>
    %222 = vector.multi_reduction <add>, %221, %cst_114 [1] : vector<8x128xf32> to vector<8xf32>
    %223 = vector.shape_cast %222 : vector<8xf32> to vector<8x1xf32>
    %cst_115 = arith.constant 7.812500e-03 : f32
    %224 = vector.broadcast %cst_115 : f32 to vector<8x1xf32>
    %225 = arith.mulf %223, %224 : vector<8x1xf32>
    %226 = arith.mulf %220, %220 : vector<8x1xf32>
    %227 = arith.subf %225, %226 : vector<8x1xf32>
    %228 = vector.broadcast %220 : vector<8x1xf32> to vector<8x128xf32>
    %229 = arith.subf %216, %228 : vector<8x128xf32>
    %cst_116 = arith.constant 9.99999974E-6 : f32
    %230 = vector.broadcast %cst_116 : f32 to vector<8x1xf32>
    %231 = arith.addf %227, %230 : vector<8x1xf32>
    %232 = math.rsqrt %231 : vector<8x1xf32>
    %233 = vector.broadcast %232 : vector<8x1xf32> to vector<8x128xf32>
    %234 = arith.mulf %229, %233 : vector<8x128xf32>
    %235 = vector.broadcast %210 : vector<1x128xf32> to vector<8x128xf32>
    %236 = arith.mulf %234, %235 : vector<8x128xf32>
    %237 = vector.broadcast %212 : vector<1x128xf32> to vector<8x128xf32>
    %238 = arith.addf %236, %237 : vector<8x128xf32>
    %239 = arith.negf %238 : vector<8x128xf32>
    %240 = math.exp %239 : vector<8x128xf32>
    %cst_117 = arith.constant 1.000000e+00 : f32
    %241 = vector.broadcast %cst_117 : f32 to vector<8x128xf32>
    %242 = arith.addf %241, %240 : vector<8x128xf32>
    %243 = arith.divf %241, %242 : vector<8x128xf32>
    %244 = arith.truncf %243 : vector<8x128xf32> to vector<8x128xbf16>
    %c0_118 = arith.constant 0 : index
    %c0_119 = arith.constant 0 : index
    %245 = vector.load %arg22[%c0_118, %c0_119] : memref<128x32xbf16, #tpu.memory_space<vmem>>, vector<128x32xbf16>
    %cst_120 = arith.constant dense<0.000000e+00> : vector<8x32xf32>
    %246 = tpu.matmul %244, %245, %cst_120 {dimension_numbers = #tpu.dot_dimension_numbers<[1], [0], [0], [1], [0, 0, 1, 1], [], []>} : vector<8x128xbf16>, vector<128x32xbf16>, vector<8x32xf32> -> vector<8x32xf32>
    %c0_121 = arith.constant 0 : index
    %c0_122 = arith.constant 0 : index
    %247 = vector.load %arg23[%c0_121, %c0_122] : memref<1x32xf32, #tpu.memory_space<vmem>>, vector<1x32xf32>
    %248 = vector.broadcast %247 : vector<1x32xf32> to vector<8x32xf32>
    %249 = arith.addf %246, %248 : vector<8x32xf32>
    %250 = arith.subf %249, %0 : vector<8x32xf32>
    %251 = arith.mulf %250, %250 : vector<8x32xf32>
    %cst_123 = arith.constant dense<0.000000e+00> : vector<8xf32>
    %252 = vector.multi_reduction <add>, %251, %cst_123 [1] : vector<8x32xf32> to vector<8xf32>
    %253 = vector.shape_cast %252 : vector<8xf32> to vector<8x1xf32>
    %254 = math.sqrt %253 : vector<8x1xf32>
    %cst_124 = arith.constant 1.000000e+00 : f32
    %255 = vector.broadcast %cst_124 : f32 to vector<8x5xf32>
    %256 = arith.addf %255, %124 : vector<8x5xf32>
    %257 = arith.mulf %119, %119 : vector<8x5xf32>
    %258 = arith.subf %256, %257 : vector<8x5xf32>
    %259 = arith.mulf %127, %127 : vector<8x5xf32>
    %260 = arith.subf %258, %259 : vector<8x5xf32>
    %cst_125 = arith.constant -5.000000e+00 : f32
    %261 = vector.broadcast %cst_125 : f32 to vector<8x5xf32>
    %262 = arith.mulf %261, %260 : vector<8x5xf32>
    %c0_126 = arith.constant 0 : index
    %c0_127 = arith.constant 0 : index
    %263 = vector.load %arg24[%c0_126, %c0_127] : memref<8x128xf32, #tpu.memory_space<vmem>>, vector<8x32xf32>
    tpu.vector_store %arg24[%c0_126, %c0_127], %249 {strides = array<i32>} : memref<8x128xf32, #tpu.memory_space<vmem>>, vector<8x32xf32>,
    %c0_128 = arith.constant 0 : index
    %c32 = arith.constant 32 : index
    %264 = vector.load %arg24[%c0_128, %c32] : memref<8x128xf32, #tpu.memory_space<vmem>>, vector<8x1xf32>
    tpu.vector_store %arg24[%c0_128, %c32], %254 {strides = array<i32>} : memref<8x128xf32, #tpu.memory_space<vmem>>, vector<8x1xf32>,
    %c0_129 = arith.constant 0 : index
    %c33 = arith.constant 33 : index
    %265 = vector.load %arg24[%c0_129, %c33] : memref<8x128xf32, #tpu.memory_space<vmem>>, vector<8x5xf32>
    tpu.vector_store %arg24[%c0_129, %c33], %262 {strides = array<i32>} : memref<8x128xf32, #tpu.memory_space<vmem>>, vector<8x5xf32>,
    %cst_130 = arith.constant 0.000000e+00 : f32
    %266 = vector.broadcast %cst_130 : f32 to vector<8x90xf32>
    %c0_131 = arith.constant 0 : index
    %c38 = arith.constant 38 : index
    %267 = vector.load %arg24[%c0_131, %c38] : memref<8x128xf32, #tpu.memory_space<vmem>>, vector<8x90xf32>
    tpu.vector_store %arg24[%c0_131, %c38], %266 {strides = array<i32>} : memref<8x128xf32, #tpu.memory_space<vmem>>, vector<8x90xf32>,
    return
  }
}

</mosaic_0001>

<bundles_post_ra>
// kernel: vae_forward.1
= control target key start
LH: loop header
LB: loop body
LE: loop exit
PB: predicated region body
PF: predicated region fallthrough
CT: control target
= control target key end

     0   :  { %s2910_s0 = inlined_call_operand.vmem [shape: f32[8,32], index: 0, kind: input, shape index: {}]   ;;  %s2911_s1 = inlined_call_operand.vmem [shape: f32[8,5], index: 1, kind: input, shape index: {}]   ;;  %s2912_s2 = inlined_call_operand.hbm [shape: bf16[32,128], index: 2, kind: input, shape index: {}]   ;;  %s2913_s3 = inlined_call_operand.hbm [shape: f32[1,128], index: 3, kind: input, shape index: {}]   ;;  %s2914_s4 = inlined_call_operand.hbm [shape: f32[1,128], index: 4, kind: input, shape index: {}]   ;;  %s2915_s5 = inlined_call_operand.hbm [shape: f32[1,128], index: 5, kind: input, shape index: {}]   ;;  %s2916_s6 = inlined_call_operand.vmem [shape: bf16[2,128,128], index: 6, kind: input, shape index: {}]   ;;  %s2917_s7 = inlined_call_operand.hbm [shape: f32[2,1,128], index: 7, kind: input, shape index: {}]   ;;  %s2918_s8 = inlined_call_operand.hbm [shape: f32[2,1,128], index: 8, kind: input, shape index: {}]   ;;  %s2919_s9 = inlined_call_operand.hbm [shape: f32[2,1,128], index: 9, kind: input, shape index: {}]   ;;  %s2920_s10 = inlined_call_operand.vmem [shape: bf16[128,5], index: 10, kind: input, shape index: {}]   ;;  %s2921_s11 = inlined_call_operand.vmem [shape: f32[1,5], index: 11, kind: input, shape index: {}]   ;;  %s2922_s12 = inlined_call_operand.vmem [shape: bf16[128,5], index: 12, kind: input, shape index: {}]   ;;  %s2923_s13 = inlined_call_operand.vmem [shape: f32[1,5], index: 13, kind: input, shape index: {}]   ;;  %s2924_s14 = inlined_call_operand.hbm [shape: bf16[5,128], index: 14, kind: input, shape index: {}]   ;;  %s2925_s15 = inlined_call_operand.hbm [shape: f32[1,128], index: 15, kind: input, shape index: {}]   ;;  %s2926_s16 = inlined_call_operand.hbm [shape: f32[1,128], index: 16, kind: input, shape index: {}]   ;;  %s2927_s17 = inlined_call_operand.hbm [shape: f32[1,128], index: 17, kind: input, shape index: {}]   ;;  %s2928_s18 = inlined_call_operand.vmem [shape: bf16[2,128,128], index: 18, kind: input, shape index: {}]   ;;  %s2929_s19 = inlined_call_operand.hbm [shape: f32[2,1,128], index: 19, kind: input, shape index: {}]   ;;  %s2930_s20 = inlined_call_operand.hbm [shape: f32[2,1,128], index: 20, kind: input, shape index: {}]   ;;  %s2931_s21 = inlined_call_operand.hbm [shape: f32[2,1,128], index: 21, kind: input, shape index: {}]   ;;  %s2932_s22 = inlined_call_operand.vmem [shape: bf16[128,32], index: 22, kind: input, shape index: {}]   ;;  %s2933_s23 = inlined_call_operand.hbm [shape: f32[1,32], index: 23, kind: input, shape index: {}]   ;;  %s2934_s24 = inlined_call_operand.vmem [shape: f32[8,128], index: 24, kind: output, shape index: {}]  }
   0x1   :  { %2944 = sst [smem:[#allocation33_spill]] %s2910_s0 }
   0x2   :  { %2945 = sst [smem:[#allocation34_spill]] %s2911_s1 }
   0x3   :  { %2946 = sst [smem:[#allocation35_spill]] %s2912_s2 }
   0x4   :  { %2947 = sst [smem:[#allocation36_spill]] %s2913_s3 }
   0x5   :  { %2948 = sst [smem:[#allocation37_spill]] %s2914_s4 }
   0x6   :  { %2949 = sst [smem:[#allocation38_spill]] %s2915_s5 }
   0x7   :  { %2950 = sst [smem:[#allocation39_spill]] %s2916_s6 }
   0x8   :  { %2951 = sst [smem:[#allocation40_spill]] %s2917_s7 }
   0x9   :  { %2952 = sst [smem:[#allocation41_spill]] %s2918_s8 }
   0xa   :  { %2953 = sst [smem:[#allocation42_spill]] %s2934_s24 }
   0xb   :  { %29 = vsyncpa [#allocation3], 0 }
   0xc   :  { %30 = vsyncpa [#allocation5], 0 }
   0xd   :  { %31 = vsyncpa [#allocation8], 0 }
   0xe   :  { %32 = vsyncpa [#allocation11], 0 }
   0xf   :  { %33 = vsyncpa [#allocation14], 0 }
  0x10   :  { %34 = vsyncpa [#allocation17], 0 }
  0x11   :  { %35 = vsyncpa [#allocation20], 0 }
  0x12   :  { %36 = vsyncpa [#allocation23], 0  ;;  %s2251_s5 = smov [#allocation4]   ;;  %s2252_s27 = smov [#allocation7]  }
  0x13   :  { %s59_s26 = sshll.u32 %s2251_s5, 4  ;;  %s79_s28 = sshll.u32 %s2252_s27, 4  ;;  %s60_s26 = int_to_ptr.vmem [resolvable:$true] %s59_s26  ;;  %s80_s28 = int_to_ptr.vmem [resolvable:$true] %s79_s28 }
  0x14   :  { %s2954_s29 = sld [smem:[#allocation36_spill]] }
  0x1a   :  { %s1905_s0 = scalar_lea.hbm %s2954_s29, 16 }
  0x1b   :  { %p1906_p0 = scmp.ne.s32.totalorder %s2954_s29, %s1905_s0  ;;  %p1909_p1 = scmp.lt.u32.totalorder %s1905_s0, %s2954_s29 }
  0x1d   :  { %p1911_p2 = pnand %p1909_p1, %p1906_p0 }
  0x1f   :  { %1914 = shalt.err (!%p1911_p2)
}
  0x20   :  { %s1915_s8 = scalar_lea.vmem %s60_s26, 16  ;;  %s1919_s4 = scalar_lea.vmem %s60_s26, 32 }
  0x21   :  { %p1916_p3 = scmp.ne.s32.totalorder %s60_s26, %s1915_s8  ;;  %p1920_p4 = scmp.lt.s32.totalorder %s60_s26, %s60_s26 }
  0x22   :  { %p1921_p5 = scmp.lt.s32.totalorder %s1919_s4, %s1915_s8 }
  0x24   :  { %p1922_p6 = por %p1921_p5, %p1920_p4 }
  0x26   :  { %p1923_p7 = pnand %p1922_p6, %p1916_p3 }
  0x28   :  { %1926 = shalt.err (!%p1923_p7)
}
  0x29   :  { %62 = dma.hbm_to_vmem [thread:$0]  %s2954_s29, 16, %s60_s26, [#allocation5]  }
  0x2a   :  { %s2955_s2 = sld [smem:[#allocation38_spill]] }
  0x30   :  { %s1927_s7 = scalar_lea.hbm %s2955_s2, 16 }
  0x31   :  { %p1928_p8 = scmp.ne.s32.totalorder %s2955_s2, %s1927_s7  ;;  %p1931_p9 = scmp.lt.u32.totalorder %s1927_s7, %s2955_s2 }
  0x33   :  { %p1933_p10 = pnand %p1931_p9, %p1928_p8 }
  0x35   :  { %1936 = shalt.err (!%p1933_p10)
}
  0x36   :  { %s1937_s8 = scalar_lea.vmem %s80_s28, 16  ;;  %s1941_s4 = scalar_lea.vmem %s80_s28, 32 }
  0x37   :  { %p1938_p11 = scmp.ne.s32.totalorder %s80_s28, %s1937_s8  ;;  %p1942_p12 = scmp.lt.s32.totalorder %s80_s28, %s80_s28 }
  0x38   :  { %p1943_p13 = scmp.lt.s32.totalorder %s1941_s4, %s1937_s8 }
  0x3a   :  { %p1944_p0 = por %p1943_p13, %p1942_p12 }
  0x3c   :  { %p1945_p1 = pnand %p1944_p0, %p1938_p11 }
  0x3e   :  { %1948 = shalt.err (!%p1945_p1)
}
  0x3f   :  { %82 = dma.hbm_to_vmem [thread:$0]  %s2955_s2, 16, %s80_s28, [#allocation8]  }
  0x40   :  { %s2253_s1 = smov [#allocation10]   ;;  %s2254_s27 = smov [#allocation13]  }
  0x41   :  { %s102_s5 = sshll.u32 %s2253_s1, 4  ;;  %s135_s6 = sshll.u32 %s2254_s27, 4  ;;  %s103_s5 = int_to_ptr.vmem [resolvable:$true] %s102_s5  ;;  %s136_s6 = int_to_ptr.vmem [resolvable:$true] %s135_s6 }
  0x42   :  { %s2956_s0 = sld [smem:[#allocation41_spill]] }
  0x48   :  { %s1949_s3 = scalar_lea.hbm %s2956_s0, 32 }
  0x49   :  { %p1950_p2 = scmp.ne.s32.totalorder %s2956_s0, %s1949_s3  ;;  %p1953_p3 = scmp.lt.u32.totalorder %s1949_s3, %s2956_s0 }
  0x4b   :  { %p1955_p4 = pnand %p1953_p3, %p1950_p2 }
  0x4d   :  { %1958 = shalt.err (!%p1955_p4)
}
  0x4e   :  { %s1959_s28 = scalar_lea.vmem %s103_s5, 32  ;;  %p1964_p6 = scmp.lt.s32.totalorder %s103_s5, %s103_s5 }
  0x4f   :  { %p1960_p5 = scmp.ne.s32.totalorder %s103_s5, %s1959_s28  ;;  %p1965_p7 = scmp.lt.s32.totalorder %s1959_s28, %s1959_s28 }
  0x51   :  { %p1966_p8 = por %p1965_p7, %p1964_p6 }
  0x53   :  { %p1967_p9 = pnand %p1966_p8, %p1960_p5 }
  0x55   :  { %1970 = shalt.err (!%p1967_p9)
}
  0x56   :  { %s2255_s2 = smov 16   ;;  %s2256_s26 = smov 1  }
  0x57   :  { %108 = dma.hbm_to_vmem [thread:$0]  %s2956_s0, 32, %s103_s5, [#allocation11], %s2255_s2, %s2255_s2, %s2256_s26  }
  0x58   :  { %s1971_s7 = scalar_lea.hbm %s2924_s14, 64 }
  0x59   :  { %p1972_p10 = scmp.ne.s32.totalorder %s2924_s14, %s1971_s7  ;;  %p1975_p11 = scmp.lt.u32.totalorder %s1971_s7, %s2924_s14 }
  0x5b   :  { %p1977_p12 = pnand %p1975_p11, %p1972_p10 }
  0x5d   :  { %1980 = shalt.err (!%p1977_p12)
}
  0x5e   :  { %s1981_s4 = scalar_lea.vmem %s136_s6, 64  ;;  %p1986_p0 = scmp.lt.s32.totalorder %s136_s6, %s136_s6 }
  0x5f   :  { %p1982_p13 = scmp.ne.s32.totalorder %s136_s6, %s1981_s4  ;;  %p1987_p1 = scmp.lt.s32.totalorder %s1981_s4, %s1981_s4 }
  0x61   :  { %p1988_p2 = por %p1987_p1, %p1986_p0 }
  0x63   :  { %p1989_p3 = pnand %p1988_p2, %p1982_p13 }
  0x65   :  { %1992 = shalt.err (!%p1989_p3)
}
  0x66   :  { %138 = dma.hbm_to_vmem [thread:$0]  %s2924_s14, 64, %s136_s6, [#allocation14]  }
  0x67   :  { %s2257_s28 = smov [#allocation16]   ;;  %s2258_s29 = smov [#allocation19]  }
  0x68   :  { %s155_s24 = sshll.u32 %s2257_s28, 4  ;;  %s176_s1 = sshll.u32 %s2258_s29, 4  ;;  %s156_s24 = int_to_ptr.vmem [resolvable:$true] %s155_s24  ;;  %s2450_s1 = int_to_ptr.vmem [resolvable:$true] %s176_s1 }
  0x69   :  { %s1993_s30 = scalar_lea.hbm %s2926_s16, 16 }
  0x6a   :  { %p1994_p4 = scmp.ne.s32.totalorder %s2926_s16, %s1993_s30  ;;  %p1997_p5 = scmp.lt.u32.totalorder %s1993_s30, %s2926_s16 }
  0x6c   :  { %p1999_p6 = pnand %p1997_p5, %p1994_p4 }
  0x6e   :  { %2002 = shalt.err (!%p1999_p6)
}
  0x6f   :  { %s2003_s14 = scalar_lea.vmem %s156_s24, 16  ;;  %s2007_s6 = scalar_lea.vmem %s156_s24, 32 }
  0x70   :  { %p2004_p7 = scmp.ne.s32.totalorder %s156_s24, %s2003_s14  ;;  %p2008_p8 = scmp.lt.s32.totalorder %s156_s24, %s156_s24 }
  0x71   :  { %p2009_p9 = scmp.lt.s32.totalorder %s2007_s6, %s2003_s14 }
  0x73   :  { %p2010_p10 = por %p2009_p9, %p2008_p8 }
  0x75   :  { %p2011_p11 = pnand %p2010_p10, %p2004_p7 }
  0x77   :  { %2014 = shalt.err (!%p2011_p11)
}
  0x78   :  { %158 = dma.hbm_to_vmem [thread:$0]  %s2926_s16, 16, %s156_s24, [#allocation17]  }
  0x79   :  { %s2015_s27 = scalar_lea.hbm %s2929_s19, 32 }
  0x7a   :  { %p2016_p12 = scmp.ne.s32.totalorder %s2929_s19, %s2015_s27  ;;  %p2019_p13 = scmp.lt.u32.totalorder %s2015_s27, %s2929_s19 }
  0x7c   :  { %p2021_p0 = pnand %p2019_p13, %p2016_p12 }
  0x7e   :  { %2024 = shalt.err (!%p2021_p0)
}
  0x7f   :  { %s2025_s8 = scalar_lea.vmem %s2450_s1, 32  ;;  %p2030_p2 = scmp.lt.s32.totalorder %s2450_s1, %s2450_s1 }
  0x80   :  { %p2026_p1 = scmp.ne.s32.totalorder %s2450_s1, %s2025_s8  ;;  %p2031_p3 = scmp.lt.s32.totalorder %s2025_s8, %s2025_s8 }
  0x82   :  { %p2032_p4 = por %p2031_p3, %p2030_p2 }
  0x84   :  { %p2033_p5 = pnand %p2032_p4, %p2026_p1 }
  0x86   :  { %2036 = shalt.err (!%p2033_p5)
}
  0x87   :  { %182 = dma.hbm_to_vmem [thread:$0]  %s2929_s19, 32, %s2450_s1, [#allocation20], %s2255_s2, %s2255_s2, %s2256_s26  }
  0x88   :  { %s2259_s4 = smov [#allocation22]   ;;  %s2260_s6 = smov [#allocation2]  }
  0x89   :  { %s200_s14 = sshll.u32 %s2259_s4, 4  ;;  %s46_s5 = sshll.u32 %s2260_s6, 4  ;;  %s201_s14 = int_to_ptr.vmem [resolvable:$true] %s200_s14  ;;  %s2484_s5 = int_to_ptr.vmem [resolvable:$true] %s46_s5 }
  0x8a   :  { %s2037_s29 = scalar_lea.hbm %s2931_s21, 32 }
  0x8b   :  { %p2038_p6 = scmp.ne.s32.totalorder %s2931_s21, %s2037_s29  ;;  %p2041_p7 = scmp.lt.u32.totalorder %s2037_s29, %s2931_s21 }
  0x8d   :  { %p2043_p8 = pnand %p2041_p7, %p2038_p6 }
  0x8f   :  { %2046 = shalt.err (!%p2043_p8)
}
  0x90   :  { %s2047_s19 = scalar_lea.vmem %s201_s14, 32  ;;  %p2052_p10 = scmp.lt.s32.totalorder %s201_s14, %s201_s14 }
  0x91   :  { %p2048_p9 = scmp.ne.s32.totalorder %s201_s14, %s2047_s19  ;;  %p2053_p11 = scmp.lt.s32.totalorder %s2047_s19, %s2047_s19 }
  0x93   :  { %p2054_p12 = por %p2053_p11, %p2052_p10 }
  0x95   :  { %p2055_p13 = pnand %p2054_p12, %p2048_p9 }
  0x97   :  { %2058 = shalt.err (!%p2055_p13)
}
  0x98   :  { %206 = dma.hbm_to_vmem [thread:$0]  %s2931_s21, 32, %s201_s14, [#allocation23], %s2255_s2, %s2255_s2, %s2256_s26  }
  0x99   :  { %s2957_s24 = sld [smem:[#allocation35_spill]] }
  0x9f   :  { %s2059_s4 = scalar_lea.hbm %s2957_s24, 256 }
  0xa0   :  { %p2060_p0 = scmp.ne.s32.totalorder %s2957_s24, %s2059_s4  ;;  %p2063_p1 = scmp.lt.u32.totalorder %s2059_s4, %s2957_s24 }
  0xa2   :  { %p2065_p2 = pnand %p2063_p1, %p2060_p0 }
  0xa4   :  { %2068 = shalt.err (!%p2065_p2)
}
  0xa5   :  { %s2069_s27 = scalar_lea.vmem %s2484_s5, 256  ;;  %p2074_p4 = scmp.lt.s32.totalorder %s2484_s5, %s2484_s5 }
  0xa6   :  { %p2070_p3 = scmp.ne.s32.totalorder %s2484_s5, %s2069_s27  ;;  %p2075_p5 = scmp.lt.s32.totalorder %s2069_s27, %s2069_s27 }
  0xa8   :  { %p2076_p6 = por %p2075_p5, %p2074_p4 }
  0xaa   :  { %p2077_p7 = pnand %p2076_p6, %p2070_p3 }
  0xac   :  { %2080 = shalt.err (!%p2077_p7)
}
  0xad   :  { %s2261_s21 = smov 64   ;;  %s2262_s14 = smov 4  }
  0xae   :  { %52 = dma.hbm_to_vmem [thread:$0]  %s2957_s24, 256, %s2484_s5, [#allocation3], %s2261_s21, %s2261_s21, %s2262_s14  }
  0xaf   :  { %s2263_s3 = smov [#allocation6]   ;;  %s2264_s1 = smov [#allocation9]  }
  0xb0   :  { %s69_s19 = sshll.u32 %s2263_s3, 4  ;;  %s90_s25 = sshll.u32 %s2264_s1, 4  ;;  %s70_s19 = int_to_ptr.vmem [resolvable:$true] %s69_s19  ;;  %s2518_s25 = int_to_ptr.vmem [resolvable:$true] %s90_s25 }
  0xb1   :  { %s2958_s4 = sld [smem:[#allocation37_spill]] }
  0xb7   :  { %s2081_s6 = scalar_lea.hbm %s2958_s4, 16 }
  0xb8   :  { %p2082_p8 = scmp.ne.s32.totalorder %s2958_s4, %s2081_s6  ;;  %p2085_p9 = scmp.lt.u32.totalorder %s2081_s6, %s2958_s4 }
  0xba   :  { %p2087_p10 = pnand %p2085_p9, %p2082_p8 }
  0xbc   :  { %2090 = shalt.err (!%p2087_p10)
}
  0xbd   :  { %s2091_s5 = scalar_lea.vmem %s70_s19, 16  ;;  %s2095_s24 = scalar_lea.vmem %s70_s19, 32 }
  0xbe   :  { %p2092_p11 = scmp.ne.s32.totalorder %s70_s19, %s2091_s5  ;;  %p2096_p12 = scmp.lt.s32.totalorder %s70_s19, %s70_s19 }
  0xbf   :  { %p2097_p13 = scmp.lt.s32.totalorder %s2095_s24, %s2091_s5 }
  0xc1   :  { %p2098_p0 = por %p2097_p13, %p2096_p12 }
  0xc3   :  { %p2099_p1 = pnand %p2098_p0, %p2092_p11 }
  0xc5   :  { %2102 = shalt.err (!%p2099_p1)
}
  0xc6   :  { %72 = dma.hbm_to_vmem [thread:$0]  %s2958_s4, 16, %s70_s19, [#allocation5]  }
  0xc7   :  { %s2959_s3 = sld [smem:[#allocation40_spill]] }
  0xcd   :  { %s2103_s1 = scalar_lea.hbm %s2959_s3, 32 }
  0xce   :  { %p2104_p2 = scmp.ne.s32.totalorder %s2959_s3, %s2103_s1  ;;  %p2107_p3 = scmp.lt.u32.totalorder %s2103_s1, %s2959_s3 }
  0xd0   :  { %p2109_p4 = pnand %p2107_p3, %p2104_p2 }
  0xd2   :  { %2112 = shalt.err (!%p2109_p4)
}
  0xd3   :  { %s2113_s28 = scalar_lea.vmem %s2518_s25, 32  ;;  %p2118_p6 = scmp.lt.s32.totalorder %s2518_s25, %s2518_s25 }
  0xd4   :  { %p2114_p5 = scmp.ne.s32.totalorder %s2518_s25, %s2113_s28  ;;  %p2119_p7 = scmp.lt.s32.totalorder %s2113_s28, %s2113_s28 }
  0xd6   :  { %p2120_p8 = por %p2119_p7, %p2118_p6 }
  0xd8   :  { %p2121_p9 = pnand %p2120_p8, %p2114_p5 }
  0xda   :  { %2124 = shalt.err (!%p2121_p9)
}
  0xdb   :  { %96 = dma.hbm_to_vmem [thread:$0]  %s2959_s3, 32, %s2518_s25, [#allocation8], %s2255_s2, %s2255_s2, %s2256_s26  }
  0xdc   :  { %s2265_s29 = smov [#allocation12]   ;;  %s2266_s5 = smov [#allocation15]  }
  0xdd   :  { %s114_s27 = sshll.u32 %s2265_s29, 4  ;;  %s145_s24 = sshll.u32 %s2266_s5, 4  ;;  %s115_s27 = int_to_ptr.vmem [resolvable:$true] %s114_s27  ;;  %s146_s24 = int_to_ptr.vmem [resolvable:$true] %s145_s24 }
  0xde   :  { %s2125_s7 = scalar_lea.hbm %s2919_s9, 32 }
  0xdf   :  { %p2126_p10 = scmp.ne.s32.totalorder %s2919_s9, %s2125_s7  ;;  %p2129_p11 = scmp.lt.u32.totalorder %s2125_s7, %s2919_s9 }
  0xe1   :  { %p2131_p12 = pnand %p2129_p11, %p2126_p10 }
  0xe3   :  { %2134 = shalt.err (!%p2131_p12)
}
  0xe4   :  { %s2135_s25 = scalar_lea.vmem %s115_s27, 32  ;;  %p2140_p0 = scmp.lt.s32.totalorder %s115_s27, %s115_s27 }
  0xe5   :  { %p2136_p13 = scmp.ne.s32.totalorder %s115_s27, %s2135_s25  ;;  %p2141_p1 = scmp.lt.s32.totalorder %s2135_s25, %s2135_s25 }
  0xe7   :  { %p2142_p2 = por %p2141_p1, %p2140_p0 }
  0xe9   :  { %p2143_p3 = pnand %p2142_p2, %p2136_p13 }
  0xeb   :  { %2146 = shalt.err (!%p2143_p3)
}
  0xec   :  { %120 = dma.hbm_to_vmem [thread:$0]  %s2919_s9, 32, %s115_s27, [#allocation11], %s2255_s2, %s2255_s2, %s2256_s26  }
  0xed   :  { %s2147_s19 = scalar_lea.hbm %s2925_s15, 16 }
  0xee   :  { %p2148_p4 = scmp.ne.s32.totalorder %s2925_s15, %s2147_s19  ;;  %p2151_p5 = scmp.lt.u32.totalorder %s2147_s19, %s2925_s15 }
  0xf0   :  { %p2153_p6 = pnand %p2151_p5, %p2148_p4 }
  0xf2   :  { %2156 = shalt.err (!%p2153_p6)
}
  0xf3   :  { %s2157_s14 = scalar_lea.vmem %s146_s24, 16  ;;  %s2161_s7 = scalar_lea.vmem %s146_s24, 32 }
  0xf4   :  { %p2158_p7 = scmp.ne.s32.totalorder %s146_s24, %s2157_s14  ;;  %p2162_p8 = scmp.lt.s32.totalorder %s146_s24, %s146_s24 }
  0xf5   :  { %p2163_p9 = scmp.lt.s32.totalorder %s2161_s7, %s2157_s14 }
  0xf7   :  { %p2164_p10 = por %p2163_p9, %p2162_p8 }
  0xf9   :  { %p2165_p11 = pnand %p2164_p10, %p2158_p7 }
  0xfb   :  { %2168 = shalt.err (!%p2165_p11)
}
  0xfc   :  { %148 = dma.hbm_to_vmem [thread:$0]  %s2925_s15, 16, %s146_s24, [#allocation14]  }
  0xfd   :  { %s2267_s30 = smov [#allocation18]   ;;  %s2268_s8 = smov [#allocation21]  }
  0xfe   :  { %s165_s1 = sshll.u32 %s2267_s30, 4  ;;  %s188_s16 = sshll.u32 %s2268_s8, 4  ;;  %s166_s1 = int_to_ptr.vmem [resolvable:$true] %s165_s1  ;;  %s2579_s16 = int_to_ptr.vmem [resolvable:$true] %s188_s16 }
  0xff   :  { %s2169_s6 = scalar_lea.hbm %s2927_s17, 16 }
 0x100   :  { %p2170_p12 = scmp.ne.s32.totalorder %s2927_s17, %s2169_s6  ;;  %p2173_p13 = scmp.lt.u32.totalorder %s2169_s6, %s2927_s17 }
 0x102   :  { %p2175_p0 = pnand %p2173_p13, %p2170_p12 }
 0x104   :  { %2178 = shalt.err (!%p2175_p0)
}
 0x105   :  { %s2179_s15 = scalar_lea.vmem %s166_s1, 16  ;;  %s2183_s24 = scalar_lea.vmem %s166_s1, 32 }
 0x106   :  { %p2180_p1 = scmp.ne.s32.totalorder %s166_s1, %s2179_s15  ;;  %p2184_p2 = scmp.lt.s32.totalorder %s166_s1, %s166_s1 }
 0x107   :  { %p2185_p3 = scmp.lt.s32.totalorder %s2183_s24, %s2179_s15 }
 0x109   :  { %p2186_p4 = por %p2185_p3, %p2184_p2 }
 0x10b   :  { %p2187_p5 = pnand %p2186_p4, %p2180_p1 }
 0x10d   :  { %2190 = shalt.err (!%p2187_p5)
}
 0x10e   :  { %168 = dma.hbm_to_vmem [thread:$0]  %s2927_s17, 16, %s166_s1, [#allocation17]  }
 0x10f   :  { %s2191_s7 = scalar_lea.hbm %s2930_s20, 32 }
 0x110   :  { %p2192_p6 = scmp.ne.s32.totalorder %s2930_s20, %s2191_s7  ;;  %p2195_p7 = scmp.lt.u32.totalorder %s2191_s7, %s2930_s20 }
 0x112   :  { %p2197_p8 = pnand %p2195_p7, %p2192_p6 }
 0x114   :  { %2200 = shalt.err (!%p2197_p8)
}
 0x115   :  { %s2201_s25 = scalar_lea.vmem %s2579_s16, 32  ;;  %p2206_p10 = scmp.lt.s32.totalorder %s2579_s16, %s2579_s16 }
 0x116   :  { %p2202_p9 = scmp.ne.s32.totalorder %s2579_s16, %s2201_s25  ;;  %p2207_p11 = scmp.lt.s32.totalorder %s2201_s25, %s2201_s25 }
 0x118   :  { %p2208_p12 = por %p2207_p11, %p2206_p10 }
 0x11a   :  { %p2209_p13 = pnand %p2208_p12, %p2202_p9 }
 0x11c   :  { %2212 = shalt.err (!%p2209_p13)
}
 0x11d   :  { %194 = dma.hbm_to_vmem [thread:$0]  %s2930_s20, 32, %s2579_s16, [#allocation20], %s2255_s2, %s2255_s2, %s2256_s26  }
 0x11e   :  { %s2269_s3 = smov [#allocation24]   ;;  %s2213_s19 = scalar_lea.hbm %s2933_s23, 16 }
 0x11f   :  { %s215_s6 = sshll.u32 %s2269_s3, 4  ;;  %p2214_p0 = scmp.ne.s32.totalorder %s2933_s23, %s2213_s19  ;;  %s216_s6 = int_to_ptr.vmem [resolvable:$true] %s215_s6 }
 0x120   :  { %p2217_p1 = scmp.lt.u32.totalorder %s2213_s19, %s2933_s23 }
 0x122   :  { %p2219_p2 = pnand %p2217_p1, %p2214_p0 }
 0x124   :  { %2222 = shalt.err (!%p2219_p2)
}
 0x125   :  { %s2223_s5 = scalar_lea.vmem %s216_s6, 16  ;;  %s2227_s20 = scalar_lea.vmem %s216_s6, 32 }
 0x126   :  { %p2224_p3 = scmp.ne.s32.totalorder %s216_s6, %s2223_s5  ;;  %p2228_p4 = scmp.lt.s32.totalorder %s216_s6, %s216_s6 }
 0x127   :  { %p2229_p5 = scmp.lt.s32.totalorder %s2227_s20, %s2223_s5 }
 0x129   :  { %p2230_p6 = por %p2229_p5, %p2228_p4 }
 0x12b   :  { %p2231_p7 = pnand %p2230_p6, %p2224_p3 }
 0x12d   :  { %2234 = shalt.err (!%p2231_p7)
}
 0x12e   :  { %218 = dma.hbm_to_vmem [thread:$0]  %s2933_s23, 16, %s216_s6, [#allocation23]  }
 0x12f   :  { %2235 = dma.done.wait [#allocation3], 256  }
 0x130   :  { %2236 = vsyncadd [#allocation3], 4294967040 }
 0x131   :  { %2237 = dma.done.wait [#allocation5], 32  }
 0x132   :  { %2238 = vsyncadd [#allocation5], 4294967264 }
 0x133   :  { %2239 = dma.done.wait [#allocation8], 48  }
 0x134   :  { %2240 = vsyncadd [#allocation8], 4294967248 }
 0x135   :  { %2241 = dma.done.wait [#allocation11], 64  }
 0x136   :  { %2242 = vsyncadd [#allocation11], 4294967232 }
 0x137   :  { %2243 = dma.done.wait [#allocation14], 80  }
 0x138   :  { %2244 = vsyncadd [#allocation14], 4294967216 }
 0x139   :  { %2245 = dma.done.wait [#allocation17], 32  }
 0x13a   :  { %2246 = vsyncadd [#allocation17], 4294967264 }
 0x13b   :  { %2247 = dma.done.wait [#allocation20], 64  }
 0x13c   :  { %2248 = vsyncadd [#allocation20], 4294967232 }
 0x13d   :  { %2249 = dma.done.wait [#allocation23], 48  }
 0x13e   :  { %2250 = vsyncadd [#allocation23], 4294967248  ;;  %v2270_v0 = vmov 0.0   ;;  %vm2271_vm0 = vmmov 0   ;;  %v1806_v1 = vld [vmem:[#allocation2] sm:$0xff]   ;;  %v1807_v2 = vld [vmem:[#allocation2 + $0x8] sm:$0xff]  }
 0x13f   :  { %1629 = vmatprep.subr.bf16.mxu1 %v2270_v0  ;;  %1633 = vmatprep.mubr.msk.bf16.mxu1 %vm2271_vm0, %v2270_v0  ;;  %s2960_s21 = sld [smem:[#allocation33_spill]]  ;;  %vm292_vm1 = vcmask 261120   ;;  %v1442_v5 = vld [vmem:[#allocation4] ss:$0 sm:$0xff]  ;;  %s2961_s9 = sld [smem:[#allocation39_spill]]  ;;  %vm911_vm2 = vcmask 1041408  }
 0x140   :  { %1657 = vmatprep.subr.bf16.mxu0 %v2270_v0  ;;  %1673 = vmatprep.mubr.msk.bf16.mxu0 %vm2271_vm0, %v2270_v0  ;;  %v1446_v29 = vld [vmem:[#allocation6] ss:$0 sm:$0xff]  ;;  %v1447_v31 = vld [vmem:[#allocation7] ss:$0 sm:$0xff]  ;;  %v1449_v39 = vld [vmem:[#allocation9] ss:$0 sm:$0xff] }
 0x141   :  { %1630 = vmatpush3.bf16.msra.mxu1 %v1806_v1  ;;  %v1458_v63 = vld [vmem:[#allocation10] ss:$0 sm:$0xff]  ;;  %vm912_vm3 = vcmask 1042432   ;;  %s2962_s2 = sld [smem:[#allocation34_spill]]  ;;  %vm907_vm4 = vcmask 39936   ;;  %vm1420_vm5 = vcmask 269568  }
 0x142   :  { %1631 = vmatprep.subr.bf16.mxu1 %v2270_v0  ;;  %s2963_s29 = sld [smem:[#allocation42_spill]]  ;;  %vm1426_vm7 = vcmask 310536   ;;  %vm1428_vm9 = vcmask 1047856  }
 0x145   :  { %v265_v3 = vld [vmem:[%s2960_s21] sm:$0xff]  ;;  %1632 = vmatpush3.bf16.msra.mxu1 %v1807_v2  ;;  %v1809_v13 = vld [vmem:[%s2961_s9 + $0x8] sm:$0xff]   ;;  %v1810_v14 = vld [vmem:[%s2961_s9 + $0x10] sm:$0xff]  }
 0x146   :  { %v273_v4 = vpack.c.bf16 %v265_v3, %v265_v3  ;;  %1637 = vmatprep.subr.bf16.mxu1 %v2270_v0  ;;  %v1808_v12 = vld [vmem:[%s2961_s9] sm:$0xff]   ;;  %v1811_v15 = vld [vmem:[%s2961_s9 + $0x18] sm:$0xff]   ;;  %v1813_v17 = vld [vmem:[%s2961_s9 + $0x28] sm:$0xff]  }
 0x147   :  { %v1812_v16 = vld [vmem:[%s2961_s9 + $0x20] sm:$0xff]   ;;  %v1814_v18 = vld [vmem:[%s2961_s9 + $0x30] sm:$0xff]   ;;  %v1815_v19 = vld [vmem:[%s2961_s9 + $0x38] sm:$0xff]  }
 0x148   :  { %1634 = vmatmul.mubr.msk.bf16.vlgmr.msra.gmra.mrb[0].mxu1 %vm292_vm1, %v273_v4  ;;  %v1816_v46 = vld [vmem:[%s2961_s9 + $0x40] sm:$0xff]   ;;  %v1817_v47 = vld [vmem:[%s2961_s9 + $0x48] sm:$0xff]   ;;  %v1818_v48 = vld [vmem:[%s2961_s9 + $0x50] sm:$0xff]  }
 0x149   :  { %1653 = vmatprep.mubr.msk.bf16.mxu1 %vm2271_vm0, %v2270_v0  ;;  %1638 = vmatpush3.bf16.msra.mxu1 %v1808_v12  ;;  %v1819_v49 = vld [vmem:[%s2961_s9 + $0x58] sm:$0xff]   ;;  %v1820_v50 = vld [vmem:[%s2961_s9 + $0x60] sm:$0xff]   ;;  %v1821_v51 = vld [vmem:[%s2961_s9 + $0x68] sm:$0xff]  }
 0x14a   :  { %1639 = vmatprep.subr.bf16.mxu1 %v2270_v0  ;;  %1658 = vmatpush3.bf16.msra.mxu0 %v1816_v46  ;;  %v1822_v52 = vld [vmem:[%s2961_s9 + $0x70] sm:$0xff]   ;;  %v1823_v53 = vld [vmem:[%s2961_s9 + $0x78] sm:$0xff]  }
 0x14b   :  { %1659 = vmatprep.subr.bf16.mxu0 %v2270_v0  ;;  %v1459_v2 = vld [vmem:[#allocation12] ss:$0 sm:$0xff] }
 0x14d   :  { %1640 = vmatpush3.bf16.msra.mxu1 %v1809_v13 }
 0x14e   :  { %1641 = vmatprep.subr.bf16.mxu1 %v2270_v0  ;;  %1660 = vmatpush3.bf16.msra.mxu0 %v1817_v47 }
 0x14f   :  { %1661 = vmatprep.subr.bf16.mxu0 %v2270_v0 }
 0x151   :  { %1642 = vmatpush3.bf16.msra.mxu1 %v1810_v14 }
 0x152   :  { %1643 = vmatprep.subr.bf16.mxu1 %v2270_v0  ;;  %1662 = vmatpush3.bf16.msra.mxu0 %v1818_v48 }
 0x153   :  { %1663 = vmatprep.subr.bf16.mxu0 %v2270_v0 }
 0x155   :  { %1644 = vmatpush3.bf16.msra.mxu1 %v1811_v15 }
 0x156   :  { %1645 = vmatprep.subr.bf16.mxu1 %v2270_v0  ;;  %1664 = vmatpush3.bf16.msra.mxu0 %v1819_v49 }
 0x157   :  { %1665 = vmatprep.subr.bf16.mxu0 %v2270_v0 }
 0x159   :  { %1646 = vmatpush3.bf16.msra.mxu1 %v1812_v16 }
 0x15a   :  { %1647 = vmatprep.subr.bf16.mxu1 %v2270_v0  ;;  %1666 = vmatpush3.bf16.msra.mxu0 %v1820_v50 }
 0x15b   :  { %1667 = vmatprep.subr.bf16.mxu0 %v2270_v0 }
 0x15d   :  { %1648 = vmatpush3.bf16.msra.mxu1 %v1813_v17  ;;  %v1824_v17 = vld [vmem:[%s2920_s10] sm:$0xff]  }
 0x15e   :  { %1649 = vmatprep.subr.bf16.mxu1 %v2270_v0  ;;  %1668 = vmatpush3.bf16.msra.mxu0 %v1821_v51 }
 0x15f   :  { %1669 = vmatprep.subr.bf16.mxu0 %v2270_v0 }
 0x161   :  { %1650 = vmatpush3.bf16.msra.mxu1 %v1814_v18  ;;  %v1825_v18 = vld [vmem:[%s2922_s12] sm:$0xff]  }
 0x162   :  { %1651 = vmatprep.subr.bf16.mxu1 %v2270_v0  ;;  %1670 = vmatpush3.bf16.msra.mxu0 %v1822_v52  ;;  %v896_v52 = vld [vmem:[#allocation13] sm:$0x7] }
 0x163   :  { %1671 = vmatprep.subr.bf16.mxu0 %v2270_v0 }
 0x165   :  { %1652 = vmatpush3.bf16.msra.mxu1 %v1815_v19  ;;  %v1826_v19 = vld [vmem:[%s2920_s10 + $0x8] sm:$0xff]  }
 0x166   :  { %1677 = vmatprep.subr.bf16.mxu1 %v2270_v0  ;;  %1672 = vmatpush3.bf16.msra.mxu0 %v1823_v53  ;;  %v2272_v53 = vmov 65535  }
 0x167   :  { %1697 = vmatprep.subr.bf16.mxu0 %v2270_v0 }
 0x21b   :  { %v330_v6 = vpop.f32.mrb[0].mxu1 }
 0x21c   :  { %v331_v7 = vadd.f32 %v1442_v5, %v330_v6  ;;  %v1635_v8 = vpop.f32.mrb[1].mxu1 }
 0x21d   :  { %v333_v9 = vpop.f32.mrb[2].mxu1 }
 0x21e   :  { %336 = vadd.xlane.f32.xlu0 %v331_v7  ;;  %v1636_v10 = vpop.f32.mrb[3].mxu1  ;;  %v339_v11 = vmul.f32 %v331_v7, %v331_v7 }
 0x21f   :  { %v1477_v10 = vld [vmem:[#allocation9 + $0x1] ss:$0 sm:$0xff] }
 0x222   :  { %340 = vadd.xlane.f32.xlu0 %v339_v11 }
 0x2ab   :  { %v337_v20 = vpop.xlane.xlu0 %336 }
 0x2ac   :  { %v338_v21 = vmul.f32 0.0078125, %v337_v20  ;;  %v1827_v20 = vld [vmem:[%s2922_s12 + $0x8] sm:$0xff]  }
 0x2ae   :  { %v343_v23 = vmul.f32 %v338_v21, %v338_v21  ;;  %v345_v27 = vsub.f32 %v331_v7, %v338_v21  ;;  %v1828_v21 = vld [vmem:[%s2920_s10 + $0x10] sm:$0xff]  }
 0x2af   :  { %v341_v22 = vpop.xlane.xlu0 %340 }
 0x2b0   :  { %v342_v24 = vmul.f32 0.0078125, %v341_v22  ;;  %v1829_v22 = vld [vmem:[%s2922_s12 + $0x10] sm:$0xff]  }
 0x2b2   :  { %v344_v25 = vsub.f32 %v342_v24, %v343_v23  ;;  %v1830_v23 = vld [vmem:[%s2920_s10 + $0x18] sm:$0xff]  }
 0x2b3   :  { %v1831_v24 = vld [vmem:[%s2922_s12 + $0x18] sm:$0xff]  }
 0x2b4   :  { %v346_v26 = vadd.f32 1e-05, %v344_v25  ;;  %v1832_v25 = vld [vmem:[%s2920_s10 + $0x20] sm:$0xff]  }
 0x2b6   :  { %1864 = vrsqrt.f32 %v346_v26  ;;  %v1833_v26 = vld [vmem:[%s2922_s12 + $0x20] sm:$0xff]  }
 0x2c0   :  { %v1865_v28 = vpop.eup %1864 }
 0x2c1   :  { %v348_v30 = vmul.f32 %v1865_v28, %v345_v27  ;;  %v1834_v27 = vld [vmem:[%s2920_s10 + $0x28] sm:$0xff]  }
 0x2c2   :  { %v1835_v28 = vld [vmem:[%s2922_s12 + $0x28] sm:$0xff]  }
 0x2c3   :  { %v355_v32 = vmul.f32 %v1446_v29, %v348_v30  ;;  %v1836_v29 = vld [vmem:[%s2920_s10 + $0x30] sm:$0xff]  }
 0x2c4   :  { %v1837_v30 = vld [vmem:[%s2922_s12 + $0x30] sm:$0xff]  }
 0x2c5   :  { %v362_v33 = vadd.f32 %v1447_v31, %v355_v32  ;;  %v1838_v31 = vld [vmem:[%s2920_s10 + $0x38] sm:$0xff]  }
 0x2c6   :  { %v1839_v32 = vld [vmem:[%s2922_s12 + $0x38] sm:$0xff]  }
 0x2c7   :  { %v1448_v34 = vmul.f32 -1.442695, %v362_v33 }
 0x2c9   :  { %1866 = vpow2.f32 %v1448_v34 }
 0x2d3   :  { %v1867_v35 = vpop.eup %1866 }
 0x2d4   :  { %v366_v36 = vadd.f32 1.0, %v1867_v35 }
 0x2d6   :  { %1868 = vrcp.f32 %v366_v36 }
 0x2e0   :  { %v1869_v37 = vpop.eup %1868 }
 0x2e1   :  { %v388_v38 = vpack.c.bf16 %v1869_v37, %v1869_v37 }
 0x2e3   :  { %1654 = vmatmul.mubr.bf16.vlgmr.msra.gmra.mrb[4].mxu1 %v388_v38 }
 0x2e4   :  { %1693 = vmatprep.mubr.msk.bf16.mxu1 %vm2271_vm0, %v2270_v0  ;;  %1678 = vmatpush3.bf16.msra.mxu1 %v1824_v17 }
 0x2e5   :  { %1679 = vmatprep.subr.bf16.mxu1 %v2270_v0 }
 0x2e8   :  { %1680 = vmatpush3.bf16.msra.mxu1 %v1826_v19 }
 0x2e9   :  { %1681 = vmatprep.subr.bf16.mxu1 %v2270_v0 }
 0x2ec   :  { %1682 = vmatpush3.bf16.msra.mxu1 %v1828_v21 }
 0x2ed   :  { %1683 = vmatprep.subr.bf16.mxu1 %v2270_v0 }
 0x2f0   :  { %1684 = vmatpush3.bf16.msra.mxu1 %v1830_v23 }
 0x2f1   :  { %1685 = vmatprep.subr.bf16.mxu1 %v2270_v0 }
 0x2f4   :  { %1686 = vmatpush3.bf16.msra.mxu1 %v1832_v25  ;;  %v1840_v25 = vld [vmem:[%s2928_s18] sm:$0xff]  }
 0x2f5   :  { %1687 = vmatprep.subr.bf16.mxu1 %v2270_v0 }
 0x2f8   :  { %1688 = vmatpush3.bf16.msra.mxu1 %v1834_v27  ;;  %v1842_v27 = vld [vmem:[%s2928_s18 + $0x10] sm:$0xff]  }
 0x2f9   :  { %1689 = vmatprep.subr.bf16.mxu1 %v2270_v0 }
 0x2fc   :  { %1690 = vmatpush3.bf16.msra.mxu1 %v1836_v29  ;;  %v1844_v29 = vld [vmem:[%s2928_s18 + $0x20] sm:$0xff]  }
 0x2fd   :  { %1691 = vmatprep.subr.bf16.mxu1 %v2270_v0 }
 0x300   :  { %1692 = vmatpush3.bf16.msra.mxu1 %v1838_v31  ;;  %v1846_v31 = vld [vmem:[%s2928_s18 + $0x30] sm:$0xff]  }
 0x301   :  { %1717 = vmatprep.subr.bf16.mxu1 %v2270_v0 }
 0x3b6   :  { %v477_v40 = vpop.f32.mrb[4].mxu1 }
 0x3b7   :  { %v478_v41 = vadd.f32 %v1449_v39, %v477_v40  ;;  %v1655_v42 = vpop.f32.mrb[5].mxu1 }
 0x3b8   :  { %v480_v43 = vpop.f32.mrb[6].mxu1  ;;  %v1486_v42 = vld [vmem:[#allocation10 + $0x1] ss:$0 sm:$0xff] }
 0x3b9   :  { %483 = vadd.xlane.f32.xlu1 %v478_v41  ;;  %v1656_v44 = vpop.f32.mrb[7].mxu1  ;;  %v486_v45 = vmul.f32 %v478_v41, %v478_v41 }
 0x3ba   :  { %v1487_v44 = vld [vmem:[#allocation12 + $0x1] ss:$0 sm:$0xff] }
 0x3bd   :  { %487 = vadd.xlane.f32.xlu1 %v486_v45 }
 0x446   :  { %v484_v54 = vpop.xlane.xlu1 %483 }
 0x447   :  { %v485_v55 = vmul.f32 0.0078125, %v484_v54  ;;  %v913_v54 = vsel %vm911_vm2, 4294967295, %v2272_v53 }
 0x449   :  { %v490_v57 = vmul.f32 %v485_v55, %v485_v55  ;;  %v492_v61 = vsub.f32 %v478_v41, %v485_v55  ;;  %v914_v55 = vsel %vm912_vm3, %v913_v54, 0 }
 0x44a   :  { %v488_v56 = vpop.xlane.xlu1 %487 }
 0x44b   :  { %v489_v58 = vmul.f32 0.0078125, %v488_v56  ;;  %v916_v56 = vand.u32 %v914_v55, %v896_v52  ;;  %v1512_v52 = vld [vmem:[#allocation19] ss:$0 sm:$0xff] }
 0x44d   :  { %v491_v59 = vsub.f32 %v489_v58, %v490_v57  ;;  %v1489_v57 = vld [vmem:[%s2921_s11] ss:$0 sm:$0xff] }
 0x44e   :  { %v1498_v58 = vld [vmem:[%s2923_s13] ss:$0 sm:$0xff] }
 0x44f   :  { %v493_v60 = vadd.f32 1e-05, %v491_v59 }
 0x451   :  { %1870 = vrsqrt.f32 %v493_v60 }
 0x45b   :  { %v1871_v62 = vpop.eup %1870 }
 0x45c   :  { %v495_v1 = vmul.f32 %v1871_v62, %v492_v61 }
 0x45e   :  { %v502_v3 = vmul.f32 %v1458_v63, %v495_v1 }
 0x460   :  { %v509_v4 = vadd.f32 %v1459_v2, %v502_v3 }
 0x462   :  { %v1460_v5 = vmul.f32 -1.442695, %v509_v4 }
 0x464   :  { %1872 = vpow2.f32 %v1460_v5 }
 0x46e   :  { %v1873_v6 = vpop.eup %1872 }
 0x46f   :  { %v513_v7 = vadd.f32 1.0, %v1873_v6 }
 0x471   :  { %1874 = vrcp.f32 %v513_v7 }
 0x47b   :  { %v1875_v8 = vpop.eup %1874 }
 0x47c   :  { %v539_v9 = vpack.c.bf16 %v1875_v8, %v1875_v8 }
 0x47e   :  { %1674 = vmatmul.mubr.bf16.vlgmr.msra.gmra.mrb[0].mxu0 %v539_v9 }
 0x47f   :  { %1713 = vmatprep.mubr.msk.bf16.mxu0 %vm2271_vm0, %v2270_v0  ;;  %1698 = vmatpush3.bf16.msra.mxu0 %v1825_v18  ;;  %v1507_v18 = vld [vmem:[#allocation15] ss:$0 sm:$0xff] }
 0x480   :  { %1699 = vmatprep.subr.bf16.mxu0 %v2270_v0 }
 0x483   :  { %1700 = vmatpush3.bf16.msra.mxu0 %v1827_v20 }
 0x484   :  { %1701 = vmatprep.subr.bf16.mxu0 %v2270_v0 }
 0x487   :  { %1702 = vmatpush3.bf16.msra.mxu0 %v1829_v22 }
 0x488   :  { %1703 = vmatprep.subr.bf16.mxu0 %v2270_v0 }
 0x48b   :  { %1704 = vmatpush3.bf16.msra.mxu0 %v1831_v24 }
 0x48c   :  { %1705 = vmatprep.subr.bf16.mxu0 %v2270_v0 }
 0x48f   :  { %1706 = vmatpush3.bf16.msra.mxu0 %v1833_v26  ;;  %v1841_v26 = vld [vmem:[%s2928_s18 + $0x8] sm:$0xff]  }
 0x490   :  { %1707 = vmatprep.subr.bf16.mxu0 %v2270_v0 }
 0x493   :  { %1708 = vmatpush3.bf16.msra.mxu0 %v1835_v28  ;;  %v1843_v28 = vld [vmem:[%s2928_s18 + $0x18] sm:$0xff]  }
 0x494   :  { %1709 = vmatprep.subr.bf16.mxu0 %v2270_v0 }
 0x497   :  { %1710 = vmatpush3.bf16.msra.mxu0 %v1837_v30  ;;  %v1845_v30 = vld [vmem:[%s2928_s18 + $0x28] sm:$0xff]  }
 0x498   :  { %1711 = vmatprep.subr.bf16.mxu0 %v2270_v0 }
 0x49b   :  { %1712 = vmatpush3.bf16.msra.mxu0 %v1839_v32  ;;  %v1847_v32 = vld [vmem:[%s2928_s18 + $0x38] sm:$0xff]  }
 0x49c   :  { %1723 = vmatprep.subr.bf16.mxu0 %v2270_v0 }
 0x551   :  { %v628_v11 = vpop.f32.mrb[0].mxu0 }
 0x552   :  { %v2707_v12 = vadd.f32 %v1477_v10, %v628_v11  ;;  %v1675_v13 = vpop.f32.mrb[1].mxu0  ;;  %v893_v11 = vld [vmem:[%s2962_s2] sm:$0xff] }
 0x553   :  { %v631_v14 = vpop.f32.mrb[2].mxu0 }
 0x554   :  { %634 = vadd.xlane.f32.xlu0 %v2707_v12  ;;  %v1676_v15 = vpop.f32.mrb[3].mxu0  ;;  %v637_v16 = vmul.f32 %v2707_v12, %v2707_v12 }
 0x556   :  { %638 = vadd.xlane.f32.xlu1 %v637_v16 }
 0x5e1   :  { %v635_v33 = vpop.xlane.xlu0 %634 }
 0x5e2   :  { %v636_v34 = vmul.f32 0.0078125, %v635_v33 }
 0x5e3   :  { %v639_v35 = vpop.xlane.xlu1 %638 }
 0x5e4   :  { %v641_v36 = vmul.f32 %v636_v34, %v636_v34  ;;  %v640_v37 = vmul.f32 0.0078125, %v639_v35  ;;  %v643_v40 = vsub.f32 %v2707_v12, %v636_v34 }
 0x5e6   :  { %v642_v38 = vsub.f32 %v640_v37, %v641_v36 }
 0x5e8   :  { %v644_v39 = vadd.f32 1e-05, %v642_v38 }
 0x5ea   :  { %1876 = vrsqrt.f32 %v644_v39 }
 0x5f4   :  { %v1877_v41 = vpop.eup %1876 }
 0x5f5   :  { %v646_v43 = vmul.f32 %v1877_v41, %v643_v40 }
 0x5f7   :  { %v653_v45 = vmul.f32 %v1486_v42, %v646_v43  ;;  %v1509_v42 = vld [vmem:[#allocation16] ss:$0 sm:$0xff] }
 0x5f9   :  { %v660_v46 = vadd.f32 %v1487_v44, %v653_v45  ;;  %v1510_v44 = vld [vmem:[#allocation18] ss:$0 sm:$0xff] }
 0x5fb   :  { %v1488_v47 = vmul.f32 -1.442695, %v660_v46 }
 0x5fd   :  { %1878 = vpow2.f32 %v1488_v47 }
 0x607   :  { %v1879_v48 = vpop.eup %1878 }
 0x608   :  { %v664_v49 = vadd.f32 1.0, %v1879_v48 }
 0x60a   :  { %1880 = vrcp.f32 %v664_v49 }
 0x614   :  { %v1881_v50 = vpop.eup %1880 }
 0x615   :  { %v667_v51 = vpack.c.bf16 %v1881_v50, %v1881_v50 }
 0x617   :  { %1694 = vmatmul.mubr.bf16.vlgmr.msra.gmra.mrb[8].mxu1 %v667_v51  ;;  %1714 = vmatmul.mubr.bf16.vlgmr.msra.gmra.mrb[4].mxu0 %v667_v51 }
 0x618   :  { %1719 = vmatprep.mubr.msk.bf16.mxu1 %vm2271_vm0, %v2270_v0  ;;  %1739 = vmatprep.mubr.msk.bf16.mxu0 %vm2271_vm0, %v2270_v0 }
 0x619   :  { %1718 = vmatpush3.bf16.msra.mxu1 %v916_v56  ;;  %1724 = vmatpush3.bf16.msra.mxu0 %v1840_v25 }
 0x61a   :  { %1743 = vmatprep.subr.bf16.mxu1 %v2270_v0  ;;  %1725 = vmatprep.subr.bf16.mxu0 %v2270_v0 }
 0x61d   :  { %1726 = vmatpush3.bf16.msra.mxu0 %v1841_v26 }
 0x61e   :  { %1727 = vmatprep.subr.bf16.mxu0 %v2270_v0 }
 0x621   :  { %1728 = vmatpush3.bf16.msra.mxu0 %v1842_v27 }
 0x622   :  { %1729 = vmatprep.subr.bf16.mxu0 %v2270_v0 }
 0x625   :  { %1730 = vmatpush3.bf16.msra.mxu0 %v1843_v28 }
 0x626   :  { %1731 = vmatprep.subr.bf16.mxu0 %v2270_v0 }
 0x629   :  { %1732 = vmatpush3.bf16.msra.mxu0 %v1844_v29 }
 0x62a   :  { %1733 = vmatprep.subr.bf16.mxu0 %v2270_v0 }
 0x62d   :  { %1734 = vmatpush3.bf16.msra.mxu0 %v1845_v30 }
 0x62e   :  { %1735 = vmatprep.subr.bf16.mxu0 %v2270_v0 }
 0x631   :  { %1736 = vmatpush3.bf16.msra.mxu0 %v1846_v31 }
 0x632   :  { %1737 = vmatprep.subr.bf16.mxu0 %v2270_v0 }
 0x635   :  { %1738 = vmatpush3.bf16.msra.mxu0 %v1847_v32  ;;  %v1856_v32 = vld [vmem:[%s2932_s22] sm:$0xff]  }
 0x636   :  { %1763 = vmatprep.subr.bf16.mxu0 %v2270_v0 }
 0x6ea   :  { %v773_v59 = vpop.f32.mrb[8].mxu1  ;;  %v884_v60 = vpop.f32.mrb[4].mxu0 }
 0x6eb   :  { %v774_v61 = vadd.f32 %v1489_v57, %v773_v59  ;;  %v885_v62 = vadd.f32 %v1498_v58, %v884_v60  ;;  %v1695_v63 = vpop.f32.mrb[9].mxu1  ;;  %v1715_v1 = vpop.f32.mrb[5].mxu0  ;;  %v1848_v59 = vld [vmem:[%s2928_s18 + $0x40] sm:$0xff]   ;;  %v1849_v60 = vld [vmem:[%s2928_s18 + $0x48] sm:$0xff]  }
 0x6ec   :  { %v776_v2 = vpop.f32.mrb[10].mxu1  ;;  %v887_v3 = vpop.f32.mrb[6].mxu0  ;;  %v1852_v63 = vld [vmem:[%s2928_s18 + $0x60] sm:$0xff]   ;;  %v1853_v1 = vld [vmem:[%s2928_s18 + $0x68] sm:$0xff]  }
 0x6ed   :  { %v1414_v4 = vmul.f32 %v774_v61, %v774_v61  ;;  %v890_v5 = vmul.f32 0.5, %v885_v62  ;;  %v1413_v6 = vadd.f32 1.0, %v885_v62  ;;  %v1696_v7 = vpop.f32.mrb[11].mxu1  ;;  %v1716_v8 = vpop.f32.mrb[7].mxu0  ;;  %v1851_v62 = vld [vmem:[%s2928_s18 + $0x58] sm:$0xff]   ;;  %v1854_v2 = vld [vmem:[%s2928_s18 + $0x70] sm:$0xff]  }
 0x6ee   :  { %v1855_v3 = vld [vmem:[%s2928_s18 + $0x78] sm:$0xff]  }
 0x6ef   :  { %v891_v9 = vmul.f32 1.442695, %v890_v5  ;;  %v1415_v10 = vsub.f32 %v1413_v6, %v1414_v4 }
 0x6f1   :  { %1882 = vpow2.f32 %v891_v9 }
 0x6fb   :  { %v1883_v12 = vpop.eup %1882 }
 0x6fc   :  { %v894_v13 = vmul.f32 %v1883_v12, %v893_v11  ;;  %v1416_v14 = vmul.f32 %v1883_v12, %v1883_v12 }
 0x6fe   :  { %v895_v15 = vadd.f32 %v894_v13, %v774_v61  ;;  %v2791_v16 = vsub.f32 %v1415_v10, %v1416_v14  ;;  %v1850_v61 = vld [vmem:[%s2928_s18 + $0x50] sm:$0xff]   ;;  %v1521_v13 = vld [vmem:[#allocation21] ss:$0 sm:$0xff]  ;;  %s2273_s18 = smov 33  }
 0x700   :  { %v900_v17 = vpack.c.bf16 %v895_v15, %v895_v15  ;;  %v1522_v15 = vld [vmem:[#allocation22] ss:$0 sm:$0xff]  ;;  %v1418_v31 = vmul.f32 -5.0, %v2791_v16  ;;  %v1859_v16 = vld [vmem:[%s2932_s22 + $0x18] sm:$0xff]  }
 0x702   :  { %1720 = vmatmul.mubr.msk.bf16.vlgmr.msra.gmra.mrb[12].mxu1 %vm907_vm4, %v900_v17 }
 0x703   :  { %1759 = vmatprep.mubr.msk.bf16.mxu1 %vm2271_vm0, %v2270_v0  ;;  %1744 = vmatpush3.bf16.msra.mxu1 %v1848_v59 }
 0x704   :  { %1745 = vmatprep.subr.bf16.mxu1 %v2270_v0 }
 0x707   :  { %1746 = vmatpush3.bf16.msra.mxu1 %v1849_v60 }
 0x708   :  { %1747 = vmatprep.subr.bf16.mxu1 %v2270_v0 }
 0x70b   :  { %1748 = vmatpush3.bf16.msra.mxu1 %v1850_v61 }
 0x70c   :  { %1749 = vmatprep.subr.bf16.mxu1 %v2270_v0 }
 0x70f   :  { %1750 = vmatpush3.bf16.msra.mxu1 %v1851_v62 }
 0x710   :  { %1751 = vmatprep.subr.bf16.mxu1 %v2270_v0 }
 0x713   :  { %1752 = vmatpush3.bf16.msra.mxu1 %v1852_v63  ;;  %v1904_v63 = vld [vmem:[%s2960_s21] sm:$0xff] }
 0x714   :  { %1753 = vmatprep.subr.bf16.mxu1 %v2270_v0 }
 0x717   :  { %1754 = vmatpush3.bf16.msra.mxu1 %v1853_v1 }
 0x718   :  { %1755 = vmatprep.subr.bf16.mxu1 %v2270_v0 }
 0x71b   :  { %1756 = vmatpush3.bf16.msra.mxu1 %v1854_v2 }
 0x71c   :  { %1757 = vmatprep.subr.bf16.mxu1 %v2270_v0 }
 0x71f   :  { %1758 = vmatpush3.bf16.msra.mxu1 %v1855_v3 }
 0x7d5   :  { %v952_v19 = vpop.f32.mrb[12].mxu1 }
 0x7d6   :  { %v953_v20 = vadd.f32 %v1507_v18, %v952_v19  ;;  %v1721_v21 = vpop.f32.mrb[13].mxu1 }
 0x7d7   :  { %v955_v22 = vpop.f32.mrb[14].mxu1 }
 0x7d8   :  { %958 = vadd.xlane.f32.xlu0 %v953_v20  ;;  %v1722_v23 = vpop.f32.mrb[15].mxu1  ;;  %v961_v24 = vmul.f32 %v953_v20, %v953_v20 }
 0x7da   :  { %962 = vadd.xlane.f32.xlu1 %v961_v24  ;;  %v1540_v24 = vld [vmem:[#allocation19 + $0x1] ss:$0 sm:$0xff] }
 0x865   :  { %v959_v33 = vpop.xlane.xlu0 %958 }
 0x866   :  { %v960_v34 = vmul.f32 0.0078125, %v959_v33  ;;  %v1857_v33 = vld [vmem:[%s2932_s22 + $0x8] sm:$0xff]  }
 0x867   :  { %v963_v35 = vpop.xlane.xlu1 %962 }
 0x868   :  { %v965_v36 = vmul.f32 %v960_v34, %v960_v34  ;;  %v964_v37 = vmul.f32 0.0078125, %v963_v35  ;;  %v967_v40 = vsub.f32 %v953_v20, %v960_v34  ;;  %v1858_v34 = vld [vmem:[%s2932_s22 + $0x10] sm:$0xff]   ;;  %v1860_v35 = vld [vmem:[%s2932_s22 + $0x20] sm:$0xff]  }
 0x86a   :  { %v966_v38 = vsub.f32 %v964_v37, %v965_v36  ;;  %v1861_v36 = vld [vmem:[%s2932_s22 + $0x28] sm:$0xff]   ;;  %v1862_v37 = vld [vmem:[%s2932_s22 + $0x30] sm:$0xff]  }
 0x86c   :  { %v968_v39 = vadd.f32 1e-05, %v966_v38  ;;  %v1863_v38 = vld [vmem:[%s2932_s22 + $0x38] sm:$0xff]  }
 0x86e   :  { %1884 = vrsqrt.f32 %v968_v39 }
 0x878   :  { %v1885_v41 = vpop.eup %1884 }
 0x879   :  { %v970_v43 = vmul.f32 %v1885_v41, %v967_v40 }
 0x87b   :  { %v977_v45 = vmul.f32 %v1509_v42, %v970_v43 }
 0x87d   :  { %v984_v46 = vadd.f32 %v1510_v44, %v977_v45 }
 0x87f   :  { %v1511_v47 = vmul.f32 -1.442695, %v984_v46 }
 0x881   :  { %1886 = vpow2.f32 %v1511_v47 }
 0x88b   :  { %v1887_v48 = vpop.eup %1886 }
 0x88c   :  { %v988_v49 = vadd.f32 1.0, %v1887_v48  ;;  %v1549_v48 = vld [vmem:[#allocation21 + $0x1] ss:$0 sm:$0xff] }
 0x88e   :  { %1888 = vrcp.f32 %v988_v49 }
 0x898   :  { %v1889_v50 = vpop.eup %1888 }
 0x899   :  { %v1010_v51 = vpack.c.bf16 %v1889_v50, %v1889_v50  ;;  %v1550_v50 = vld [vmem:[#allocation22 + $0x1] ss:$0 sm:$0xff] }
 0x89b   :  { %1740 = vmatmul.mubr.bf16.vlgmr.msra.gmra.mrb[8].mxu0 %v1010_v51 }
 0x89c   :  { %1779 = vmatprep.mubr.msk.bf16.mxu0 %vm2271_vm0, %v2270_v0  ;;  %1764 = vmatpush3.bf16.msra.mxu0 %v1856_v32 }
 0x89d   :  { %1765 = vmatprep.subr.bf16.mxu0 %v2270_v0 }
 0x8a0   :  { %1766 = vmatpush3.bf16.msra.mxu0 %v1857_v33 }
 0x8a1   :  { %1767 = vmatprep.subr.bf16.mxu0 %v2270_v0 }
 0x8a4   :  { %1768 = vmatpush3.bf16.msra.mxu0 %v1858_v34 }
 0x8a5   :  { %1769 = vmatprep.subr.bf16.mxu0 %v2270_v0 }
 0x8a8   :  { %1770 = vmatpush3.bf16.msra.mxu0 %v1859_v16 }
 0x8a9   :  { %1771 = vmatprep.subr.bf16.mxu0 %v2270_v0 }
 0x8ac   :  { %1772 = vmatpush3.bf16.msra.mxu0 %v1860_v35 }
 0x8ad   :  { %1773 = vmatprep.subr.bf16.mxu0 %v2270_v0 }
 0x8b0   :  { %1774 = vmatpush3.bf16.msra.mxu0 %v1861_v36 }
 0x8b1   :  { %1775 = vmatprep.subr.bf16.mxu0 %v2270_v0 }
 0x8b4   :  { %1776 = vmatpush3.bf16.msra.mxu0 %v1862_v37 }
 0x8b5   :  { %1777 = vmatprep.subr.bf16.mxu0 %v2270_v0 }
 0x8b8   :  { %1778 = vmatpush3.bf16.msra.mxu0 %v1863_v38 }
 0x96e   :  { %v1099_v53 = vpop.f32.mrb[8].mxu0 }
 0x96f   :  { %v1100_v54 = vadd.f32 %v1512_v52, %v1099_v53  ;;  %v1741_v55 = vpop.f32.mrb[9].mxu0 }
 0x970   :  { %v1102_v56 = vpop.f32.mrb[10].mxu0 }
 0x971   :  { %1105 = vadd.xlane.f32.xlu0 %v1100_v54  ;;  %v1742_v57 = vpop.f32.mrb[11].mxu0  ;;  %v1108_v58 = vmul.f32 %v1100_v54, %v1100_v54 }
 0x973   :  { %1109 = vadd.xlane.f32.xlu1 %v1108_v58  ;;  %v1552_v58 = vld [vmem:[#allocation24] ss:$0 sm:$0xff] }
 0x9fe   :  { %v1106_v4 = vpop.xlane.xlu0 %1105 }
 0x9ff   :  { %v1107_v5 = vmul.f32 0.0078125, %v1106_v4 }
 0xa00   :  { %v1110_v6 = vpop.xlane.xlu1 %1109 }
 0xa01   :  { %v1112_v7 = vmul.f32 %v1107_v5, %v1107_v5  ;;  %v1111_v8 = vmul.f32 0.0078125, %v1110_v6  ;;  %v1114_v11 = vsub.f32 %v1100_v54, %v1107_v5 }
 0xa03   :  { %v1113_v9 = vsub.f32 %v1111_v8, %v1112_v7 }
 0xa05   :  { %v1115_v10 = vadd.f32 1e-05, %v1113_v9 }
 0xa07   :  { %1890 = vrsqrt.f32 %v1115_v10 }
 0xa11   :  { %v1891_v12 = vpop.eup %1890 }
 0xa12   :  { %v1117_v14 = vmul.f32 %v1891_v12, %v1114_v11 }
 0xa14   :  { %v1124_v17 = vmul.f32 %v1521_v13, %v1117_v14 }
 0xa16   :  { %v1131_v18 = vadd.f32 %v1522_v15, %v1124_v17 }
 0xa18   :  { %v1523_v19 = vmul.f32 -1.442695, %v1131_v18 }
 0xa1a   :  { %1892 = vpow2.f32 %v1523_v19 }
 0xa24   :  { %v1893_v20 = vpop.eup %1892 }
 0xa25   :  { %v1135_v21 = vadd.f32 1.0, %v1893_v20 }
 0xa27   :  { %1894 = vrcp.f32 %v1135_v21 }
 0xa31   :  { %v1895_v22 = vpop.eup %1894 }
 0xa32   :  { %v1161_v23 = vpack.c.bf16 %v1895_v22, %v1895_v22 }
 0xa34   :  { %1760 = vmatmul.mubr.bf16.vlgmr.msra.gmra.mrb[16].mxu1 %v1161_v23 }
 0xb07   :  { %v1250_v25 = vpop.f32.mrb[16].mxu1 }
 0xb08   :  { %v1251_v26 = vadd.f32 %v1540_v24, %v1250_v25  ;;  %v1761_v27 = vpop.f32.mrb[17].mxu1 }
 0xb09   :  { %v1253_v28 = vpop.f32.mrb[18].mxu1 }
 0xb0a   :  { %1256 = vadd.xlane.f32.xlu0 %v1251_v26  ;;  %v1762_v29 = vpop.f32.mrb[19].mxu1  ;;  %v1259_v30 = vmul.f32 %v1251_v26, %v1251_v26 }
 0xb0c   :  { %1260 = vadd.xlane.f32.xlu1 %v1259_v30 }
 0xb1d   :  { %1423 = vrot.lane.b32.xlu1 %v1418_v31, %s2273_s18 }
 0xb97   :  { %v1257_v39 = vpop.xlane.xlu0 %1256 }
 0xb98   :  { %v1258_v40 = vmul.f32 0.0078125, %v1257_v39 }
 0xb99   :  { %v1261_v41 = vpop.xlane.xlu1 %1260 }
 0xb9a   :  { %v1263_v42 = vmul.f32 %v1258_v40, %v1258_v40  ;;  %v1262_v43 = vmul.f32 0.0078125, %v1261_v41  ;;  %v1265_v46 = vsub.f32 %v1251_v26, %v1258_v40 }
 0xb9c   :  { %v1264_v44 = vsub.f32 %v1262_v43, %v1263_v42 }
 0xb9d   :  { %v1424_v11 = vpop.permute.xlu1 %1423 }
 0xb9e   :  { %v1266_v45 = vadd.f32 1e-05, %v1264_v44 }
 0xba0   :  { %1896 = vrsqrt.f32 %v1266_v45 }
 0xbaa   :  { %v1897_v47 = vpop.eup %1896 }
 0xbab   :  { %v1268_v49 = vmul.f32 %v1897_v47, %v1265_v46 }
 0xbad   :  { %v1275_v51 = vmul.f32 %v1549_v48, %v1268_v49 }
 0xbaf   :  { %v1282_v52 = vadd.f32 %v1550_v50, %v1275_v51 }
 0xbb1   :  { %v1551_v53 = vmul.f32 -1.442695, %v1282_v52 }
 0xbb3   :  { %1898 = vpow2.f32 %v1551_v53 }
 0xbbd   :  { %v1899_v54 = vpop.eup %1898 }
 0xbbe   :  { %v1286_v55 = vadd.f32 1.0, %v1899_v54 }
 0xbc0   :  { %1900 = vrcp.f32 %v1286_v55 }
 0xbca   :  { %v1901_v56 = vpop.eup %1900 }
 0xbcb   :  { %v1289_v57 = vpack.c.bf16 %v1901_v56, %v1901_v56 }
 0xbcd   :  { %1780 = vmatmul.mubr.bf16.vlgmr.msra.gmra.mrb[12].mxu0 %v1289_v57 }
 0xca0   :  { %v1395_v59 = vpop.f32.mrb[12].mxu0 }
 0xca1   :  { %v1396_v60 = vadd.f32 %v1552_v58, %v1395_v59  ;;  %v1781_v61 = vpop.f32.mrb[13].mxu0 }
 0xca2   :  { %v1398_v62 = vpop.f32.mrb[14].mxu0 }
 0xca3   :  { %v1401_v1 = vsub.f32 %v1396_v60, %v1904_v63  ;;  %1419 = vst.msk [vmem:[%s2963_s29] sm:$0xff] %vm292_vm1, %v1396_v60  ;;  %v1782_v2 = vpop.f32.mrb[15].mxu0 }
 0xca5   :  { %v1402_v3 = vmul.f32 %v1401_v1, %v1401_v1 }
 0xca7   :  { %v1403_v4 = vsel %vm292_vm1, %v1402_v3, 0.0 }
 0xca8   :  { %1404 = vadd.xlane.f32.xlu0 %v1403_v4 }
 0xd35   :  { %v1405_v5 = vpop.xlane.xlu0 %1404 }
 0xd36   :  { %1902 = vrsqrt.f32 %v1405_v5  ;;  %vm1408_vm6 = vcmp.eq.f32.partialorder %v1405_v5, inf  ;;  %v1411_v8 = vand.u32 2147483648, %v1405_v5  ;;  %vm1410_vm8 = vcmp.eq.f32.partialorder %v1405_v5, 0.0 }
 0xd40   :  { %v1903_v6 = vpop.eup %1902 }
 0xd41   :  { %v1407_v7 = vmul.f32 %v1903_v6, %v1405_v5 }
 0xd43   :  { %v1409_v9 = vsel %vm1408_vm6, %v1405_v5, %v1407_v7 }
 0xd44   :  { %v1412_v10 = vsel %vm1410_vm8, %v1411_v8, %v1409_v9 }
 0xd45   :  { %1421 = vst.msk [vmem:[%s2963_s29] sm:$0xff] %vm1420_vm5, %v1412_v10 }
 0xd46   :  { %1427 = vst.msk [vmem:[%s2963_s29] sm:$0xff] %vm1426_vm7, %v1424_v11 }
 0xd47   :  { %1429 = vst.msk [vmem:[%s2963_s29] sm:$0xff] %vm1428_vm9, %v2270_v0 }
 0xd48   :  { %1434 = vsyncpa [#allocation3], 1 }
 0xd49   :  { %1435 = vsyncpa [#allocation5], 1 }
 0xd4a   :  { %1436 = vsyncpa [#allocation8], 1 }
 0xd4b   :  { %1437 = vsyncpa [#allocation11], 1 }
 0xd4c   :  { %1438 = vsyncpa [#allocation14], 1 }
 0xd4d   :  { %1439 = vsyncpa [#allocation17], 1 }
 0xd4e   :  { %1440 = vsyncpa [#allocation20], 1 }
 0xd4f   :  { %1441 = vsyncpa [#allocation23], 1 }

</bundles_post_ra>
